<compile_context>
chip_gen: v7x
topology: tpu7x:2x2x1
jax: 0.10.0
libtpu: 0.0.40
codegen_flags: <defaults>
</compile_context>

<pallas_src>
from functools import partial

import jax
import jax.numpy as jnp
from jax.experimental import pallas as pl
from jax.experimental.pallas import tpu as pltpu

_LANE = 128


# ---------------------------------------------------------------------------
# In-kernel helpers
# ---------------------------------------------------------------------------

def _conv1x1(w_ref, b_ref, chans):
    """1x1 conv as unrolled scalar*vector FMAs on the VPU.

    w_ref: SMEM (C_out, C_in); b_ref: SMEM (C_out,); chans: list of C_in
    dense (N, rows, 128) f32 arrays.  Returns list of C_out arrays.
    (For C >= ~64 an MXU jnp.dot over a (spatial, C) view would win; at C=4
    the MXU would be <=4/128 utilized, so the VPU path is the right one.)
    """
    c_out, c_in = w_ref.shape
    outs = []
    for co in range(c_out):
        acc = w_ref[co, 0] * chans[0] + b_ref[co]
        for ci in range(1, c_in):
            acc = acc + w_ref[co, ci] * chans[ci]
        outs.append(acc)
    return outs


def _bn_train(ys, g_ref, be_ref, eps, relu6):
    """Training-mode BatchNorm (biased variance) on fully resident channels."""
    outs = []
    for c, y in enumerate(ys):
        m = jnp.mean(y, keepdims=True)
        v = jnp.mean((y - m) * (y - m), keepdims=True)
        z = (y - m) * jax.lax.rsqrt(v + eps) * g_ref[c] + be_ref[c]
        outs.append(jnp.clip(z, 0.0, 6.0) if relu6 else z)
    return outs


def _stats_slab(ys):
    """Per-channel (sum, sum-of-squares), reduced over batch + sublanes.

    ys: list of C arrays (N, rows, 128).  Returns one (2C, 128) slab so the
    accumulator update is a single unmasked block read-modify-write.
    """
    rows = [jnp.sum(y, axis=(0, 1)) for y in ys]
    rows += [jnp.sum(y * y, axis=(0, 1)) for y in ys]
    return jnp.stack(rows, axis=0)


# ---------------------------------------------------------------------------
# Kernels
# ---------------------------------------------------------------------------

def _fused_kernel(x_ref, w1_ref, b1_ref, g1_ref, be1_ref,
                  w2_ref, b2_ref, g2_ref, be2_ref, o_ref, *, eps):
    """Whole block in one pass: x resident in VMEM, exact BN statistics."""
    x = x_ref[...]                                   # (N, C, R, 128) f32
    xc = [x[:, c] for c in range(x.shape[1])]        # dense (N, R, 128) slices
    h = _bn_train(_conv1x1(w1_ref, b1_ref, xc), g1_ref, be1_ref, eps, relu6=True)
    z = _bn_train(_conv1x1(w2_ref, b2_ref, h), g2_ref, be2_ref, eps, relu6=False)
    out = [jnp.clip(z[c] + xc[c], 0.0, 6.0) for c in range(len(z))]
    o_ref[...] = jnp.stack(out, axis=1)              # single full-block store


def _stats1_kernel(x_ref, w1_ref, b1_ref, st_ref):
    """Pass 1 (tiled): conv1, accumulate per-channel sum / sumsq slab."""
    @pl.when(pl.program_id(1) == 0)
    def _init():
        st_ref[...] = jnp.zeros_like(st_ref)

    x = x_ref[...]
    xc = [x[:, c] for c in range(x.shape[1])]
    y1 = _conv1x1(w1_ref, b1_ref, xc)
    st_ref[...] += _stats_slab(y1)[None]


def _stats2_kernel(x_ref, w1_ref, b1_ref, a1_ref, w2_ref, b2_ref, st_ref):
    """Pass 2 (tiled): recompute conv1, BN1+ReLU6, conv2, accumulate stats2."""
    @pl.when(pl.program_id(1) == 0)
    def _init():
        st_ref[...] = jnp.zeros_like(st_ref)

    x = x_ref[...]
    xc = [x[:, c] for c in range(x.shape[1])]
    y1 = _conv1x1(w1_ref, b1_ref, xc)
    h = [jnp.clip(y1[c] * a1_ref[0, c] + a1_ref[1, c], 0.0, 6.0)
         for c in range(len(y1))]
    y2 = _conv1x1(w2_ref, b2_ref, h)
    st_ref[...] += _stats_slab(y2)[None]


def _finalize_kernel(x_ref, w1_ref, b1_ref, a1_ref, w2_ref, b2_ref, a2_ref, o_ref):
    """Pass 3 (tiled): conv1 -> BN1 -> ReLU6 -> conv2 -> BN2 -> +id -> ReLU6."""
    x = x_ref[...]
    xc = [x[:, c] for c in range(x.shape[1])]
    y1 = _conv1x1(w1_ref, b1_ref, xc)
    h = [jnp.clip(y1[c] * a1_ref[0, c] + a1_ref[1, c], 0.0, 6.0)
         for c in range(len(y1))]
    y2 = _conv1x1(w2_ref, b2_ref, h)
    out = [jnp.clip(y2[c] * a2_ref[0, c] + a2_ref[1, c] + xc[c], 0.0, 6.0)
           for c in range(len(y2))]
    o_ref[...] = jnp.stack(out, axis=1)               # single full-block store


# ---------------------------------------------------------------------------
# Host-side helpers
# ---------------------------------------------------------------------------

def _affine_from_stats(stats_slabs, gamma, beta, count, eps):
    """Finish BN: (scale, shift) from accumulated (slabs, 2C, 128) sums.

    NOTE: E[y^2] - mean^2 in f32 can cancel for huge counts / magnitudes; the
    fused path (exact mean/var) is preferred whenever the tensor fits VMEM.
    """
    s = jnp.sum(stats_slabs, axis=(0, 2))             # (2C,)
    c = gamma.shape[0]
    mean = s[:c] / count
    var = jnp.maximum(s[c:] / count - mean * mean, 0.0)   # biased (torch train)
    scale = gamma * jax.lax.rsqrt(var + eps)
    shift = beta - mean * scale
    return jnp.stack([scale, shift], axis=0).astype(jnp.float32)   # (2, C)


def _vmem_capacity_bytes():
    try:
        return int(pltpu.get_tpu_info().vmem_capacity_bytes)
    except Exception:
        return 64 * 1024 * 1024      # conservative: v7x has 64 MiB / TensorCore


def _pick_row_tile(rows, n, c, target_bytes):
    """Largest multiple-of-8 divisor of `rows` whose x-block is <= target."""
    if rows <= 8 or rows % 8 != 0:
        return rows
    bytes_per_row = n * c * _LANE * 4
    cap = max(8, (target_bytes // bytes_per_row) // 8 * 8)
    best, t = 8, 8
    while t <= min(rows, cap):
        if rows % t == 0:
            best = t
        t += 8
    return best


def basic_block(x_nchw, params, eps=1e-5, max_fused_bytes=None,
                target_block_bytes=4 * 1024 * 1024):
    """x_nchw: (N, C, H, W) f32.  Residual requires in_channels == out_channels."""
    N, C, H, W = x_nchw.shape
    HW = H * W
    assert HW % _LANE == 0, "H*W must be a multiple of 128"
    R = HW // _LANE

    w1 = params["w1"].astype(jnp.float32)       # (C_mid, C_in) torch layout
    b1 = params["b1"].astype(jnp.float32)
    g1 = params["g1"].astype(jnp.float32)
    be1 = params["be1"].astype(jnp.float32)
    w2 = params["w2"].astype(jnp.float32)       # (C_out, C_mid)
    b2 = params["b2"].astype(jnp.float32)
    g2 = params["g2"].astype(jnp.float32)
    be2 = params["be2"].astype(jnp.float32)
    c_mid, c_in = w1.shape
    c_out = w2.shape[0]
    assert c_in == C and w2.shape[1] == c_mid and c_out == C, \
        "residual add requires in_channels == out_channels"

    # Free row-major view: lanes = 128 contiguous spatial positions, sublanes =
    # rows of the flattened H*W axis.  Dense (8,128) tiles for any N / C.
    x4 = x_nchw.reshape(N, C, R, _LANE).astype(jnp.float32)
    x_bytes = N * C * HW * 4

    vmem_cap = _vmem_capacity_bytes()
    vmem_limit = min(int(0.75 * vmem_cap), 96 * 1024 * 1024)
    if max_fused_bytes is None:
        max_fused_bytes = int(0.6 * vmem_cap)

    smem = pl.BlockSpec(memory_space=pltpu.MemorySpace.SMEM)
    full_spec = pl.BlockSpec((N, C, R, _LANE), lambda i: (0, 0, 0, 0))

    # ---- Fused single-pass path: 1 HBM read + 1 HBM write, exact BN moments.
    if 8 * x_bytes <= max_fused_bytes:
        out4 = pl.pallas_call(
            partial(_fused_kernel, eps=eps),
            out_shape=jax.ShapeDtypeStruct((N, C, R, _LANE), jnp.float32),
            grid=(1,),
            in_specs=[full_spec] + [smem] * 8,
            out_specs=full_spec,
            compiler_params=pltpu.CompilerParams(
                dimension_semantics=("arbitrary",),
                vmem_limit_bytes=vmem_limit),
        )(x4, w1, b1, g1, be1, w2, b2, g2, be2)
        return out4.reshape(N, C, H, W)

    # ---- Tiled three-pass path (tensor too large for VMEM residency).
    r_tile = _pick_row_tile(R, N, C, target_block_bytes)
    num_tiles = R // r_tile
    num_slabs = 2 if num_tiles % 2 == 0 else 1   # lets v7x use both TensorCores
    tps = num_tiles // num_slabs                 # row tiles per slab
    count = float(N * HW)

    x_spec = pl.BlockSpec((N, C, r_tile, _LANE),
                          lambda p, t: (0, 0, p * tps + t, 0))
    st1_spec = pl.BlockSpec((1, 2 * c_mid, _LANE), lambda p, t: (p, 0, 0))
    st2_spec = pl.BlockSpec((1, 2 * c_out, _LANE), lambda p, t: (p, 0, 0))
    acc_cp = pltpu.CompilerParams(
        dimension_semantics=("parallel", "arbitrary"),
        vmem_limit_bytes=vmem_limit)

    # Pass 1: conv1 + BN1 statistics (lane-reduced slab accumulator).
    stats1 = pl.pallas_call(
        _stats1_kernel,
        out_shape=jax.ShapeDtypeStruct((num_slabs, 2 * c_mid, _LANE), jnp.float32),
        grid=(num_slabs, tps),
        in_specs=[x_spec, smem, smem],
        out_specs=st1_spec,
        compiler_params=acc_cp,
    )(x4, w1, b1)
    a1 = _affine_from_stats(stats1, g1, be1, count, eps)

    # Pass 2: (recompute conv1) -> BN1 -> ReLU6 -> conv2 + BN2 statistics.
    stats2 = pl.pallas_call(
        _stats2_kernel,
        out_shape=jax.ShapeDtypeStruct((num_slabs, 2 * c_out, _LANE), jnp.float32),
        grid=(num_slabs, tps),
        in_specs=[x_spec, smem, smem, smem, smem, smem],
        out_specs=st2_spec,
        compiler_params=acc_cp,
    )(x4, w1, b1, a1, w2, b2)
    a2 = _affine_from_stats(stats2, g2, be2, count, eps)

    # Pass 3: full forward with known statistics, residual, final ReLU6.
    io_spec = pl.BlockSpec((N, C, r_tile, _LANE), lambda t: (0, 0, t, 0))
    out4 = pl.pallas_call(
        _finalize_kernel,
        out_shape=jax.ShapeDtypeStruct((N, C, R, _LANE), jnp.float32),
        grid=(num_tiles,),
        in_specs=[io_spec, smem, smem, smem, smem, smem, smem],
        out_specs=io_spec,
        compiler_params=pltpu.CompilerParams(
            dimension_semantics=("parallel",),
            vmem_limit_bytes=vmem_limit),
    )(x4, w1, b1, a1, w2, b2, a2)
    return out4.reshape(N, C, H, W)


def basic_block_reference(x, params, eps=1e-5):
    """Pure-JAX reference matching the torch forward (training-mode BN)."""
    def conv1x1(t, w, b):
        return jnp.einsum("oc,nchw->nohw", w, t) + b[None, :, None, None]

    def bn_train(t, g, b):
        m = t.mean(axis=(0, 2, 3), keepdims=True)
        v = t.var(axis=(0, 2, 3), keepdims=True)   # biased variance (train mode)
        return (t - m) / jnp.sqrt(v + eps) * g[None, :, None, None] + b[None, :, None, None]

    identity = x
    out = conv1x1(x, params["w1"], params["b1"])
    out = bn_train(out, params["g1"], params["be1"])
    out = jnp.clip(out, 0.0, 6.0)
    out = conv1x1(out, params["w2"], params["b2"])
    out = bn_train(out, params["g2"], params["be2"])
    out = out + identity
    return jnp.clip(out, 0.0, 6.0)


if __name__ == "__main__":
    # BasicBlock(in_channels=4, out_channels=4); residual needs equal channels.
    in_channels = out_channels = mid_channels = 4
    N, H, W = 2, 16, 16

    key = jax.random.PRNGKey(0)
    ks = jax.random.split(key, 8)
    x = jax.random.normal(ks[0], (N, in_channels, H, W), dtype=jnp.float32)

    params = {
        "w1": 0.3 * jax.random.normal(ks[1], (mid_channels, in_channels), jnp.float32),
        "b1": 0.1 * jax.random.normal(ks[2], (mid_channels,), jnp.float32),
        "g1": 1.0 + 0.1 * jax.random.normal(ks[3], (mid_channels,), jnp.float32),
        "be1": 0.1 * jax.random.normal(ks[4], (mid_channels,), jnp.float32),
        "w2": 0.3 * jax.random.normal(ks[5], (out_channels, mid_channels), jnp.float32),
        "b2": 0.1 * jax.random.normal(ks[6], (out_channels,), jnp.float32),
        "g2": jnp.ones((out_channels,), jnp.float32),
        "be2": jnp.zeros((out_channels,), jnp.float32),
    }

    # --- Test 1: spec shape (2,4,16,16) -> fused single-pass path.
    fwd = jax.jit(basic_block)
    out = jax.block_until_ready(fwd(x, params))
    ref = jax.block_until_ready(basic_block_reference(x, params))
    assert out.shape == (N, out_channels, H, W), out.shape
    err = float(jnp.max(jnp.abs(out - ref)))
    assert jnp.allclose(out, ref, atol=1e-3, rtol=1e-3), f"fused mismatch: {err}"

    # --- Test 2: larger spatial, forced tiled path (small block target) to
    # exercise the cross-tile stats accumulator and the 2-slab parallel split.
    x2 = jax.random.normal(ks[7], (N, in_channels, 64, 64), dtype=jnp.float32)
    fwd_tiled = jax.jit(partial(basic_block, max_fused_bytes=0,
                                target_block_bytes=32 * 1024))
    out2 = jax.block_until_ready(fwd_tiled(x2, params))
    ref2 = jax.block_until_ready(basic_block_reference(x2, params))
    err2 = float(jnp.max(jnp.abs(out2 - ref2)))
    assert jnp.allclose(out2, ref2, atol=1e-3, rtol=1e-3), f"tiled mismatch: {err2}"

    print("KERNEL_OK")
</pallas_src>

<mosaic_0001>
module attributes {stable_mosaic.version = 11 : i64} {
  func.func @_fused_kernel(%arg0: i32, %arg1: memref<2x4x2x128xf32, #tpu.memory_space<vmem>>, %arg2: memref<4x4xf32, #tpu.memory_space<smem>>, %arg3: memref<4xf32, #tpu.memory_space<smem>>, %arg4: memref<4xf32, #tpu.memory_space<smem>>, %arg5: memref<4xf32, #tpu.memory_space<smem>>, %arg6: memref<4x4xf32, #tpu.memory_space<smem>>, %arg7: memref<4xf32, #tpu.memory_space<smem>>, %arg8: memref<4xf32, #tpu.memory_space<smem>>, %arg9: memref<4xf32, #tpu.memory_space<smem>>, %arg10: memref<2x4x2x128xf32, #tpu.memory_space<vmem>>) attributes {dimension_semantics = [#tpu.dimension_semantics<arbitrary>], iteration_bounds = array<i64: 1>, scalar_prefetch = 0 : i64, scratch_operands = 0 : i64, tpu.core_type = #tpu.core_type<tc>, window_params = [{pipeline_mode = #tpu.pipeline_mode<synchronous>, transform_indices = @transform_0, window_bounds = array<i64: 2, 4, 2, 128>}, {transform_indices = @transform_1, window_bounds = array<i64: 4, 4>}, {transform_indices = @transform_2, window_bounds = array<i64: 4>}, {transform_indices = @transform_3, window_bounds = array<i64: 4>}, {transform_indices = @transform_4, window_bounds = array<i64: 4>}, {transform_indices = @transform_5, window_bounds = array<i64: 4, 4>}, {transform_indices = @transform_6, window_bounds = array<i64: 4>}, {transform_indices = @transform_7, window_bounds = array<i64: 4>}, {transform_indices = @transform_8, window_bounds = array<i64: 4>}, {pipeline_mode = #tpu.pipeline_mode<synchronous>, transform_indices = @transform_9, window_bounds = array<i64: 2, 4, 2, 128>}]} {
    %c0 = arith.constant 0 : index
    %c0_0 = arith.constant 0 : index
    %c0_1 = arith.constant 0 : index
    %c0_2 = arith.constant 0 : index
    %0 = vector.load %arg1[%c0, %c0_0, %c0_1, %c0_2] : memref<2x4x2x128xf32, #tpu.memory_space<vmem>>, vector<2x4x2x128xf32>
    %1 = vector.extract_strided_slice %0 {offsets = [0, 0, 0, 0], sizes = [2, 1, 2, 128], strides = [1, 1, 1, 1]} : vector<2x4x2x128xf32> to vector<2x1x2x128xf32>
    %2 = vector.shape_cast %1 : vector<2x1x2x128xf32> to vector<2x2x128xf32>
    %3 = vector.extract_strided_slice %0 {offsets = [0, 1, 0, 0], sizes = [2, 1, 2, 128], strides = [1, 1, 1, 1]} : vector<2x4x2x128xf32> to vector<2x1x2x128xf32>
    %4 = vector.shape_cast %3 : vector<2x1x2x128xf32> to vector<2x2x128xf32>
    %5 = vector.extract_strided_slice %0 {offsets = [0, 2, 0, 0], sizes = [2, 1, 2, 128], strides = [1, 1, 1, 1]} : vector<2x4x2x128xf32> to vector<2x1x2x128xf32>
    %6 = vector.shape_cast %5 : vector<2x1x2x128xf32> to vector<2x2x128xf32>
    %7 = vector.extract_strided_slice %0 {offsets = [0, 3, 0, 0], sizes = [2, 1, 2, 128], strides = [1, 1, 1, 1]} : vector<2x4x2x128xf32> to vector<2x1x2x128xf32>
    %8 = vector.shape_cast %7 : vector<2x1x2x128xf32> to vector<2x2x128xf32>
    %c0_3 = arith.constant 0 : index
    %c0_4 = arith.constant 0 : index
    %9 = memref.load %arg2[%c0_3, %c0_4] : memref<4x4xf32, #tpu.memory_space<smem>>
    %10 = vector.broadcast %9 : f32 to vector<2x2x128xf32>
    %11 = arith.mulf %10, %2 : vector<2x2x128xf32>
    %c0_5 = arith.constant 0 : index
    %12 = memref.load %arg3[%c0_5] : memref<4xf32, #tpu.memory_space<smem>>
    %13 = vector.broadcast %12 : f32 to vector<2x2x128xf32>
    %14 = arith.addf %11, %13 : vector<2x2x128xf32>
    %c0_6 = arith.constant 0 : index
    %c1 = arith.constant 1 : index
    %15 = memref.load %arg2[%c0_6, %c1] : memref<4x4xf32, #tpu.memory_space<smem>>
    %16 = vector.broadcast %15 : f32 to vector<2x2x128xf32>
    %17 = arith.mulf %16, %4 : vector<2x2x128xf32>
    %18 = arith.addf %14, %17 : vector<2x2x128xf32>
    %c0_7 = arith.constant 0 : index
    %c2 = arith.constant 2 : index
    %19 = memref.load %arg2[%c0_7, %c2] : memref<4x4xf32, #tpu.memory_space<smem>>
    %20 = vector.broadcast %19 : f32 to vector<2x2x128xf32>
    %21 = arith.mulf %20, %6 : vector<2x2x128xf32>
    %22 = arith.addf %18, %21 : vector<2x2x128xf32>
    %c0_8 = arith.constant 0 : index
    %c3 = arith.constant 3 : index
    %23 = memref.load %arg2[%c0_8, %c3] : memref<4x4xf32, #tpu.memory_space<smem>>
    %24 = vector.broadcast %23 : f32 to vector<2x2x128xf32>
    %25 = arith.mulf %24, %8 : vector<2x2x128xf32>
    %26 = arith.addf %22, %25 : vector<2x2x128xf32>
    %c1_9 = arith.constant 1 : index
    %c0_10 = arith.constant 0 : index
    %27 = memref.load %arg2[%c1_9, %c0_10] : memref<4x4xf32, #tpu.memory_space<smem>>
    %28 = vector.broadcast %27 : f32 to vector<2x2x128xf32>
    %29 = arith.mulf %28, %2 : vector<2x2x128xf32>
    %c1_11 = arith.constant 1 : index
    %30 = memref.load %arg3[%c1_11] : memref<4xf32, #tpu.memory_space<smem>>
    %31 = vector.broadcast %30 : f32 to vector<2x2x128xf32>
    %32 = arith.addf %29, %31 : vector<2x2x128xf32>
    %c1_12 = arith.constant 1 : index
    %c1_13 = arith.constant 1 : index
    %33 = memref.load %arg2[%c1_12, %c1_13] : memref<4x4xf32, #tpu.memory_space<smem>>
    %34 = vector.broadcast %33 : f32 to vector<2x2x128xf32>
    %35 = arith.mulf %34, %4 : vector<2x2x128xf32>
    %36 = arith.addf %32, %35 : vector<2x2x128xf32>
    %c1_14 = arith.constant 1 : index
    %c2_15 = arith.constant 2 : index
    %37 = memref.load %arg2[%c1_14, %c2_15] : memref<4x4xf32, #tpu.memory_space<smem>>
    %38 = vector.broadcast %37 : f32 to vector<2x2x128xf32>
    %39 = arith.mulf %38, %6 : vector<2x2x128xf32>
    %40 = arith.addf %36, %39 : vector<2x2x128xf32>
    %c1_16 = arith.constant 1 : index
    %c3_17 = arith.constant 3 : index
    %41 = memref.load %arg2[%c1_16, %c3_17] : memref<4x4xf32, #tpu.memory_space<smem>>
    %42 = vector.broadcast %41 : f32 to vector<2x2x128xf32>
    %43 = arith.mulf %42, %8 : vector<2x2x128xf32>
    %44 = arith.addf %40, %43 : vector<2x2x128xf32>
    %c2_18 = arith.constant 2 : index
    %c0_19 = arith.constant 0 : index
    %45 = memref.load %arg2[%c2_18, %c0_19] : memref<4x4xf32, #tpu.memory_space<smem>>
    %46 = vector.broadcast %45 : f32 to vector<2x2x128xf32>
    %47 = arith.mulf %46, %2 : vector<2x2x128xf32>
    %c2_20 = arith.constant 2 : index
    %48 = memref.load %arg3[%c2_20] : memref<4xf32, #tpu.memory_space<smem>>
    %49 = vector.broadcast %48 : f32 to vector<2x2x128xf32>
    %50 = arith.addf %47, %49 : vector<2x2x128xf32>
    %c2_21 = arith.constant 2 : index
    %c1_22 = arith.constant 1 : index
    %51 = memref.load %arg2[%c2_21, %c1_22] : memref<4x4xf32, #tpu.memory_space<smem>>
    %52 = vector.broadcast %51 : f32 to vector<2x2x128xf32>
    %53 = arith.mulf %52, %4 : vector<2x2x128xf32>
    %54 = arith.addf %50, %53 : vector<2x2x128xf32>
    %c2_23 = arith.constant 2 : index
    %c2_24 = arith.constant 2 : index
    %55 = memref.load %arg2[%c2_23, %c2_24] : memref<4x4xf32, #tpu.memory_space<smem>>
    %56 = vector.broadcast %55 : f32 to vector<2x2x128xf32>
    %57 = arith.mulf %56, %6 : vector<2x2x128xf32>
    %58 = arith.addf %54, %57 : vector<2x2x128xf32>
    %c2_25 = arith.constant 2 : index
    %c3_26 = arith.constant 3 : index
    %59 = memref.load %arg2[%c2_25, %c3_26] : memref<4x4xf32, #tpu.memory_space<smem>>
    %60 = vector.broadcast %59 : f32 to vector<2x2x128xf32>
    %61 = arith.mulf %60, %8 : vector<2x2x128xf32>
    %62 = arith.addf %58, %61 : vector<2x2x128xf32>
    %c3_27 = arith.constant 3 : index
    %c0_28 = arith.constant 0 : index
    %63 = memref.load %arg2[%c3_27, %c0_28] : memref<4x4xf32, #tpu.memory_space<smem>>
    %64 = vector.broadcast %63 : f32 to vector<2x2x128xf32>
    %65 = arith.mulf %64, %2 : vector<2x2x128xf32>
    %c3_29 = arith.constant 3 : index
    %66 = memref.load %arg3[%c3_29] : memref<4xf32, #tpu.memory_space<smem>>
    %67 = vector.broadcast %66 : f32 to vector<2x2x128xf32>
    %68 = arith.addf %65, %67 : vector<2x2x128xf32>
    %c3_30 = arith.constant 3 : index
    %c1_31 = arith.constant 1 : index
    %69 = memref.load %arg2[%c3_30, %c1_31] : memref<4x4xf32, #tpu.memory_space<smem>>
    %70 = vector.broadcast %69 : f32 to vector<2x2x128xf32>
    %71 = arith.mulf %70, %4 : vector<2x2x128xf32>
    %72 = arith.addf %68, %71 : vector<2x2x128xf32>
    %c3_32 = arith.constant 3 : index
    %c2_33 = arith.constant 2 : index
    %73 = memref.load %arg2[%c3_32, %c2_33] : memref<4x4xf32, #tpu.memory_space<smem>>
    %74 = vector.broadcast %73 : f32 to vector<2x2x128xf32>
    %75 = arith.mulf %74, %6 : vector<2x2x128xf32>
    %76 = arith.addf %72, %75 : vector<2x2x128xf32>
    %c3_34 = arith.constant 3 : index
    %c3_35 = arith.constant 3 : index
    %77 = memref.load %arg2[%c3_34, %c3_35] : memref<4x4xf32, #tpu.memory_space<smem>>
    %78 = vector.broadcast %77 : f32 to vector<2x2x128xf32>
    %79 = arith.mulf %78, %8 : vector<2x2x128xf32>
    %80 = arith.addf %76, %79 : vector<2x2x128xf32>
    %81 = vector.shape_cast %26 : vector<2x2x128xf32> to vector<1x2x2x128xf32>
    %cst = arith.constant dense<0.000000e+00> : vector<1xf32>
    %82 = vector.multi_reduction <add>, %81, %cst [1, 2, 3] : vector<1x2x2x128xf32> to vector<1xf32>
    %83 = vector.shape_cast %82 : vector<1xf32> to vector<1x1x1x1xf32>
    %84 = vector.extract %83[0, 0, 0, 0] : f32 from vector<1x1x1x1xf32>
    %85 = vector.broadcast %84 : f32 to vector<1x1x1xf32>
    %cst_36 = arith.constant 5.120000e+02 : f32
    %86 = vector.broadcast %cst_36 : f32 to vector<1x1x1xf32>
    %87 = arith.divf %85, %86 : vector<1x1x1xf32>
    %88 = vector.broadcast %87 : vector<1x1x1xf32> to vector<2x2x128xf32>
    %89 = arith.subf %26, %88 : vector<2x2x128xf32>
    %90 = vector.broadcast %87 : vector<1x1x1xf32> to vector<2x2x128xf32>
    %91 = arith.subf %26, %90 : vector<2x2x128xf32>
    %92 = arith.mulf %89, %91 : vector<2x2x128xf32>
    %93 = vector.shape_cast %92 : vector<2x2x128xf32> to vector<1x2x2x128xf32>
    %cst_37 = arith.constant dense<0.000000e+00> : vector<1xf32>
    %94 = vector.multi_reduction <add>, %93, %cst_37 [1, 2, 3] : vector<1x2x2x128xf32> to vector<1xf32>
    %95 = vector.shape_cast %94 : vector<1xf32> to vector<1x1x1x1xf32>
    %96 = vector.extract %95[0, 0, 0, 0] : f32 from vector<1x1x1x1xf32>
    %97 = vector.broadcast %96 : f32 to vector<1x1x1xf32>
    %cst_38 = arith.constant 5.120000e+02 : f32
    %98 = vector.broadcast %cst_38 : f32 to vector<1x1x1xf32>
    %99 = arith.divf %97, %98 : vector<1x1x1xf32>
    %100 = vector.broadcast %87 : vector<1x1x1xf32> to vector<2x2x128xf32>
    %101 = arith.subf %26, %100 : vector<2x2x128xf32>
    %cst_39 = arith.constant 9.99999974E-6 : f32
    %102 = vector.broadcast %cst_39 : f32 to vector<1x1x1xf32>
    %103 = arith.addf %99, %102 : vector<1x1x1xf32>
    %104 = math.rsqrt %103 : vector<1x1x1xf32>
    %105 = vector.broadcast %104 : vector<1x1x1xf32> to vector<2x2x128xf32>
    %106 = arith.mulf %101, %105 : vector<2x2x128xf32>
    %c0_40 = arith.constant 0 : index
    %107 = memref.load %arg4[%c0_40] : memref<4xf32, #tpu.memory_space<smem>>
    %108 = vector.broadcast %107 : f32 to vector<2x2x128xf32>
    %109 = arith.mulf %106, %108 : vector<2x2x128xf32>
    %c0_41 = arith.constant 0 : index
    %110 = memref.load %arg5[%c0_41] : memref<4xf32, #tpu.memory_space<smem>>
    %111 = vector.broadcast %110 : f32 to vector<2x2x128xf32>
    %112 = arith.addf %109, %111 : vector<2x2x128xf32>
    %cst_42 = arith.constant 0.000000e+00 : f32
    %cst_43 = arith.constant 6.000000e+00 : f32
    %113 = vector.broadcast %cst_42 : f32 to vector<2x2x128xf32>
    %114 = arith.maximumf %113, %112 : vector<2x2x128xf32>
    %115 = vector.broadcast %cst_43 : f32 to vector<2x2x128xf32>
    %116 = arith.minimumf %115, %114 : vector<2x2x128xf32>
    %117 = vector.shape_cast %44 : vector<2x2x128xf32> to vector<1x2x2x128xf32>
    %cst_44 = arith.constant dense<0.000000e+00> : vector<1xf32>
    %118 = vector.multi_reduction <add>, %117, %cst_44 [1, 2, 3] : vector<1x2x2x128xf32> to vector<1xf32>
    %119 = vector.shape_cast %118 : vector<1xf32> to vector<1x1x1x1xf32>
    %120 = vector.extract %119[0, 0, 0, 0] : f32 from vector<1x1x1x1xf32>
    %121 = vector.broadcast %120 : f32 to vector<1x1x1xf32>
    %cst_45 = arith.constant 5.120000e+02 : f32
    %122 = vector.broadcast %cst_45 : f32 to vector<1x1x1xf32>
    %123 = arith.divf %121, %122 : vector<1x1x1xf32>
    %124 = vector.broadcast %123 : vector<1x1x1xf32> to vector<2x2x128xf32>
    %125 = arith.subf %44, %124 : vector<2x2x128xf32>
    %126 = vector.broadcast %123 : vector<1x1x1xf32> to vector<2x2x128xf32>
    %127 = arith.subf %44, %126 : vector<2x2x128xf32>
    %128 = arith.mulf %125, %127 : vector<2x2x128xf32>
    %129 = vector.shape_cast %128 : vector<2x2x128xf32> to vector<1x2x2x128xf32>
    %cst_46 = arith.constant dense<0.000000e+00> : vector<1xf32>
    %130 = vector.multi_reduction <add>, %129, %cst_46 [1, 2, 3] : vector<1x2x2x128xf32> to vector<1xf32>
    %131 = vector.shape_cast %130 : vector<1xf32> to vector<1x1x1x1xf32>
    %132 = vector.extract %131[0, 0, 0, 0] : f32 from vector<1x1x1x1xf32>
    %133 = vector.broadcast %132 : f32 to vector<1x1x1xf32>
    %cst_47 = arith.constant 5.120000e+02 : f32
    %134 = vector.broadcast %cst_47 : f32 to vector<1x1x1xf32>
    %135 = arith.divf %133, %134 : vector<1x1x1xf32>
    %136 = vector.broadcast %123 : vector<1x1x1xf32> to vector<2x2x128xf32>
    %137 = arith.subf %44, %136 : vector<2x2x128xf32>
    %cst_48 = arith.constant 9.99999974E-6 : f32
    %138 = vector.broadcast %cst_48 : f32 to vector<1x1x1xf32>
    %139 = arith.addf %135, %138 : vector<1x1x1xf32>
    %140 = math.rsqrt %139 : vector<1x1x1xf32>
    %141 = vector.broadcast %140 : vector<1x1x1xf32> to vector<2x2x128xf32>
    %142 = arith.mulf %137, %141 : vector<2x2x128xf32>
    %c1_49 = arith.constant 1 : index
    %143 = memref.load %arg4[%c1_49] : memref<4xf32, #tpu.memory_space<smem>>
    %144 = vector.broadcast %143 : f32 to vector<2x2x128xf32>
    %145 = arith.mulf %142, %144 : vector<2x2x128xf32>
    %c1_50 = arith.constant 1 : index
    %146 = memref.load %arg5[%c1_50] : memref<4xf32, #tpu.memory_space<smem>>
    %147 = vector.broadcast %146 : f32 to vector<2x2x128xf32>
    %148 = arith.addf %145, %147 : vector<2x2x128xf32>
    %cst_51 = arith.constant 0.000000e+00 : f32
    %cst_52 = arith.constant 6.000000e+00 : f32
    %149 = vector.broadcast %cst_51 : f32 to vector<2x2x128xf32>
    %150 = arith.maximumf %149, %148 : vector<2x2x128xf32>
    %151 = vector.broadcast %cst_52 : f32 to vector<2x2x128xf32>
    %152 = arith.minimumf %151, %150 : vector<2x2x128xf32>
    %153 = vector.shape_cast %62 : vector<2x2x128xf32> to vector<1x2x2x128xf32>
    %cst_53 = arith.constant dense<0.000000e+00> : vector<1xf32>
    %154 = vector.multi_reduction <add>, %153, %cst_53 [1, 2, 3] : vector<1x2x2x128xf32> to vector<1xf32>
    %155 = vector.shape_cast %154 : vector<1xf32> to vector<1x1x1x1xf32>
    %156 = vector.extract %155[0, 0, 0, 0] : f32 from vector<1x1x1x1xf32>
    %157 = vector.broadcast %156 : f32 to vector<1x1x1xf32>
    %cst_54 = arith.constant 5.120000e+02 : f32
    %158 = vector.broadcast %cst_54 : f32 to vector<1x1x1xf32>
    %159 = arith.divf %157, %158 : vector<1x1x1xf32>
    %160 = vector.broadcast %159 : vector<1x1x1xf32> to vector<2x2x128xf32>
    %161 = arith.subf %62, %160 : vector<2x2x128xf32>
    %162 = vector.broadcast %159 : vector<1x1x1xf32> to vector<2x2x128xf32>
    %163 = arith.subf %62, %162 : vector<2x2x128xf32>
    %164 = arith.mulf %161, %163 : vector<2x2x128xf32>
    %165 = vector.shape_cast %164 : vector<2x2x128xf32> to vector<1x2x2x128xf32>
    %cst_55 = arith.constant dense<0.000000e+00> : vector<1xf32>
    %166 = vector.multi_reduction <add>, %165, %cst_55 [1, 2, 3] : vector<1x2x2x128xf32> to vector<1xf32>
    %167 = vector.shape_cast %166 : vector<1xf32> to vector<1x1x1x1xf32>
    %168 = vector.extract %167[0, 0, 0, 0] : f32 from vector<1x1x1x1xf32>
    %169 = vector.broadcast %168 : f32 to vector<1x1x1xf32>
    %cst_56 = arith.constant 5.120000e+02 : f32
    %170 = vector.broadcast %cst_56 : f32 to vector<1x1x1xf32>
    %171 = arith.divf %169, %170 : vector<1x1x1xf32>
    %172 = vector.broadcast %159 : vector<1x1x1xf32> to vector<2x2x128xf32>
    %173 = arith.subf %62, %172 : vector<2x2x128xf32>
    %cst_57 = arith.constant 9.99999974E-6 : f32
    %174 = vector.broadcast %cst_57 : f32 to vector<1x1x1xf32>
    %175 = arith.addf %171, %174 : vector<1x1x1xf32>
    %176 = math.rsqrt %175 : vector<1x1x1xf32>
    %177 = vector.broadcast %176 : vector<1x1x1xf32> to vector<2x2x128xf32>
    %178 = arith.mulf %173, %177 : vector<2x2x128xf32>
    %c2_58 = arith.constant 2 : index
    %179 = memref.load %arg4[%c2_58] : memref<4xf32, #tpu.memory_space<smem>>
    %180 = vector.broadcast %179 : f32 to vector<2x2x128xf32>
    %181 = arith.mulf %178, %180 : vector<2x2x128xf32>
    %c2_59 = arith.constant 2 : index
    %182 = memref.load %arg5[%c2_59] : memref<4xf32, #tpu.memory_space<smem>>
    %183 = vector.broadcast %182 : f32 to vector<2x2x128xf32>
    %184 = arith.addf %181, %183 : vector<2x2x128xf32>
    %cst_60 = arith.constant 0.000000e+00 : f32
    %cst_61 = arith.constant 6.000000e+00 : f32
    %185 = vector.broadcast %cst_60 : f32 to vector<2x2x128xf32>
    %186 = arith.maximumf %185, %184 : vector<2x2x128xf32>
    %187 = vector.broadcast %cst_61 : f32 to vector<2x2x128xf32>
    %188 = arith.minimumf %187, %186 : vector<2x2x128xf32>
    %189 = vector.shape_cast %80 : vector<2x2x128xf32> to vector<1x2x2x128xf32>
    %cst_62 = arith.constant dense<0.000000e+00> : vector<1xf32>
    %190 = vector.multi_reduction <add>, %189, %cst_62 [1, 2, 3] : vector<1x2x2x128xf32> to vector<1xf32>
    %191 = vector.shape_cast %190 : vector<1xf32> to vector<1x1x1x1xf32>
    %192 = vector.extract %191[0, 0, 0, 0] : f32 from vector<1x1x1x1xf32>
    %193 = vector.broadcast %192 : f32 to vector<1x1x1xf32>
    %cst_63 = arith.constant 5.120000e+02 : f32
    %194 = vector.broadcast %cst_63 : f32 to vector<1x1x1xf32>
    %195 = arith.divf %193, %194 : vector<1x1x1xf32>
    %196 = vector.broadcast %195 : vector<1x1x1xf32> to vector<2x2x128xf32>
    %197 = arith.subf %80, %196 : vector<2x2x128xf32>
    %198 = vector.broadcast %195 : vector<1x1x1xf32> to vector<2x2x128xf32>
    %199 = arith.subf %80, %198 : vector<2x2x128xf32>
    %200 = arith.mulf %197, %199 : vector<2x2x128xf32>
    %201 = vector.shape_cast %200 : vector<2x2x128xf32> to vector<1x2x2x128xf32>
    %cst_64 = arith.constant dense<0.000000e+00> : vector<1xf32>
    %202 = vector.multi_reduction <add>, %201, %cst_64 [1, 2, 3] : vector<1x2x2x128xf32> to vector<1xf32>
    %203 = vector.shape_cast %202 : vector<1xf32> to vector<1x1x1x1xf32>
    %204 = vector.extract %203[0, 0, 0, 0] : f32 from vector<1x1x1x1xf32>
    %205 = vector.broadcast %204 : f32 to vector<1x1x1xf32>
    %cst_65 = arith.constant 5.120000e+02 : f32
    %206 = vector.broadcast %cst_65 : f32 to vector<1x1x1xf32>
    %207 = arith.divf %205, %206 : vector<1x1x1xf32>
    %208 = vector.broadcast %195 : vector<1x1x1xf32> to vector<2x2x128xf32>
    %209 = arith.subf %80, %208 : vector<2x2x128xf32>
    %cst_66 = arith.constant 9.99999974E-6 : f32
    %210 = vector.broadcast %cst_66 : f32 to vector<1x1x1xf32>
    %211 = arith.addf %207, %210 : vector<1x1x1xf32>
    %212 = math.rsqrt %211 : vector<1x1x1xf32>
    %213 = vector.broadcast %212 : vector<1x1x1xf32> to vector<2x2x128xf32>
    %214 = arith.mulf %209, %213 : vector<2x2x128xf32>
    %c3_67 = arith.constant 3 : index
    %215 = memref.load %arg4[%c3_67] : memref<4xf32, #tpu.memory_space<smem>>
    %216 = vector.broadcast %215 : f32 to vector<2x2x128xf32>
    %217 = arith.mulf %214, %216 : vector<2x2x128xf32>
    %c3_68 = arith.constant 3 : index
    %218 = memref.load %arg5[%c3_68] : memref<4xf32, #tpu.memory_space<smem>>
    %219 = vector.broadcast %218 : f32 to vector<2x2x128xf32>
    %220 = arith.addf %217, %219 : vector<2x2x128xf32>
    %cst_69 = arith.constant 0.000000e+00 : f32
    %cst_70 = arith.constant 6.000000e+00 : f32
    %221 = vector.broadcast %cst_69 : f32 to vector<2x2x128xf32>
    %222 = arith.maximumf %221, %220 : vector<2x2x128xf32>
    %223 = vector.broadcast %cst_70 : f32 to vector<2x2x128xf32>
    %224 = arith.minimumf %223, %222 : vector<2x2x128xf32>
    %c0_71 = arith.constant 0 : index
    %c0_72 = arith.constant 0 : index
    %225 = memref.load %arg6[%c0_71, %c0_72] : memref<4x4xf32, #tpu.memory_space<smem>>
    %226 = vector.broadcast %225 : f32 to vector<2x2x128xf32>
    %227 = arith.mulf %226, %116 : vector<2x2x128xf32>
    %c0_73 = arith.constant 0 : index
    %228 = memref.load %arg7[%c0_73] : memref<4xf32, #tpu.memory_space<smem>>
    %229 = vector.broadcast %228 : f32 to vector<2x2x128xf32>
    %230 = arith.addf %227, %229 : vector<2x2x128xf32>
    %c0_74 = arith.constant 0 : index
    %c1_75 = arith.constant 1 : index
    %231 = memref.load %arg6[%c0_74, %c1_75] : memref<4x4xf32, #tpu.memory_space<smem>>
    %232 = vector.broadcast %231 : f32 to vector<2x2x128xf32>
    %233 = arith.mulf %232, %152 : vector<2x2x128xf32>
    %234 = arith.addf %230, %233 : vector<2x2x128xf32>
    %c0_76 = arith.constant 0 : index
    %c2_77 = arith.constant 2 : index
    %235 = memref.load %arg6[%c0_76, %c2_77] : memref<4x4xf32, #tpu.memory_space<smem>>
    %236 = vector.broadcast %235 : f32 to vector<2x2x128xf32>
    %237 = arith.mulf %236, %188 : vector<2x2x128xf32>
    %238 = arith.addf %234, %237 : vector<2x2x128xf32>
    %c0_78 = arith.constant 0 : index
    %c3_79 = arith.constant 3 : index
    %239 = memref.load %arg6[%c0_78, %c3_79] : memref<4x4xf32, #tpu.memory_space<smem>>
    %240 = vector.broadcast %239 : f32 to vector<2x2x128xf32>
    %241 = arith.mulf %240, %224 : vector<2x2x128xf32>
    %242 = arith.addf %238, %241 : vector<2x2x128xf32>
    %c1_80 = arith.constant 1 : index
    %c0_81 = arith.constant 0 : index
    %243 = memref.load %arg6[%c1_80, %c0_81] : memref<4x4xf32, #tpu.memory_space<smem>>
    %244 = vector.broadcast %243 : f32 to vector<2x2x128xf32>
    %245 = arith.mulf %244, %116 : vector<2x2x128xf32>
    %c1_82 = arith.constant 1 : index
    %246 = memref.load %arg7[%c1_82] : memref<4xf32, #tpu.memory_space<smem>>
    %247 = vector.broadcast %246 : f32 to vector<2x2x128xf32>
    %248 = arith.addf %245, %247 : vector<2x2x128xf32>
    %c1_83 = arith.constant 1 : index
    %c1_84 = arith.constant 1 : index
    %249 = memref.load %arg6[%c1_83, %c1_84] : memref<4x4xf32, #tpu.memory_space<smem>>
    %250 = vector.broadcast %249 : f32 to vector<2x2x128xf32>
    %251 = arith.mulf %250, %152 : vector<2x2x128xf32>
    %252 = arith.addf %248, %251 : vector<2x2x128xf32>
    %c1_85 = arith.constant 1 : index
    %c2_86 = arith.constant 2 : index
    %253 = memref.load %arg6[%c1_85, %c2_86] : memref<4x4xf32, #tpu.memory_space<smem>>
    %254 = vector.broadcast %253 : f32 to vector<2x2x128xf32>
    %255 = arith.mulf %254, %188 : vector<2x2x128xf32>
    %256 = arith.addf %252, %255 : vector<2x2x128xf32>
    %c1_87 = arith.constant 1 : index
    %c3_88 = arith.constant 3 : index
    %257 = memref.load %arg6[%c1_87, %c3_88] : memref<4x4xf32, #tpu.memory_space<smem>>
    %258 = vector.broadcast %257 : f32 to vector<2x2x128xf32>
    %259 = arith.mulf %258, %224 : vector<2x2x128xf32>
    %260 = arith.addf %256, %259 : vector<2x2x128xf32>
    %c2_89 = arith.constant 2 : index
    %c0_90 = arith.constant 0 : index
    %261 = memref.load %arg6[%c2_89, %c0_90] : memref<4x4xf32, #tpu.memory_space<smem>>
    %262 = vector.broadcast %261 : f32 to vector<2x2x128xf32>
    %263 = arith.mulf %262, %116 : vector<2x2x128xf32>
    %c2_91 = arith.constant 2 : index
    %264 = memref.load %arg7[%c2_91] : memref<4xf32, #tpu.memory_space<smem>>
    %265 = vector.broadcast %264 : f32 to vector<2x2x128xf32>
    %266 = arith.addf %263, %265 : vector<2x2x128xf32>
    %c2_92 = arith.constant 2 : index
    %c1_93 = arith.constant 1 : index
    %267 = memref.load %arg6[%c2_92, %c1_93] : memref<4x4xf32, #tpu.memory_space<smem>>
    %268 = vector.broadcast %267 : f32 to vector<2x2x128xf32>
    %269 = arith.mulf %268, %152 : vector<2x2x128xf32>
    %270 = arith.addf %266, %269 : vector<2x2x128xf32>
    %c2_94 = arith.constant 2 : index
    %c2_95 = arith.constant 2 : index
    %271 = memref.load %arg6[%c2_94, %c2_95] : memref<4x4xf32, #tpu.memory_space<smem>>
    %272 = vector.broadcast %271 : f32 to vector<2x2x128xf32>
    %273 = arith.mulf %272, %188 : vector<2x2x128xf32>
    %274 = arith.addf %270, %273 : vector<2x2x128xf32>
    %c2_96 = arith.constant 2 : index
    %c3_97 = arith.constant 3 : index
    %275 = memref.load %arg6[%c2_96, %c3_97] : memref<4x4xf32, #tpu.memory_space<smem>>
    %276 = vector.broadcast %275 : f32 to vector<2x2x128xf32>
    %277 = arith.mulf %276, %224 : vector<2x2x128xf32>
    %278 = arith.addf %274, %277 : vector<2x2x128xf32>
    %c3_98 = arith.constant 3 : index
    %c0_99 = arith.constant 0 : index
    %279 = memref.load %arg6[%c3_98, %c0_99] : memref<4x4xf32, #tpu.memory_space<smem>>
    %280 = vector.broadcast %279 : f32 to vector<2x2x128xf32>
    %281 = arith.mulf %280, %116 : vector<2x2x128xf32>
    %c3_100 = arith.constant 3 : index
    %282 = memref.load %arg7[%c3_100] : memref<4xf32, #tpu.memory_space<smem>>
    %283 = vector.broadcast %282 : f32 to vector<2x2x128xf32>
    %284 = arith.addf %281, %283 : vector<2x2x128xf32>
    %c3_101 = arith.constant 3 : index
    %c1_102 = arith.constant 1 : index
    %285 = memref.load %arg6[%c3_101, %c1_102] : memref<4x4xf32, #tpu.memory_space<smem>>
    %286 = vector.broadcast %285 : f32 to vector<2x2x128xf32>
    %287 = arith.mulf %286, %152 : vector<2x2x128xf32>
    %288 = arith.addf %284, %287 : vector<2x2x128xf32>
    %c3_103 = arith.constant 3 : index
    %c2_104 = arith.constant 2 : index
    %289 = memref.load %arg6[%c3_103, %c2_104] : memref<4x4xf32, #tpu.memory_space<smem>>
    %290 = vector.broadcast %289 : f32 to vector<2x2x128xf32>
    %291 = arith.mulf %290, %188 : vector<2x2x128xf32>
    %292 = arith.addf %288, %291 : vector<2x2x128xf32>
    %c3_105 = arith.constant 3 : index
    %c3_106 = arith.constant 3 : index
    %293 = memref.load %arg6[%c3_105, %c3_106] : memref<4x4xf32, #tpu.memory_space<smem>>
    %294 = vector.broadcast %293 : f32 to vector<2x2x128xf32>
    %295 = arith.mulf %294, %224 : vector<2x2x128xf32>
    %296 = arith.addf %292, %295 : vector<2x2x128xf32>
    %297 = vector.shape_cast %242 : vector<2x2x128xf32> to vector<1x2x2x128xf32>
    %cst_107 = arith.constant dense<0.000000e+00> : vector<1xf32>
    %298 = vector.multi_reduction <add>, %297, %cst_107 [1, 2, 3] : vector<1x2x2x128xf32> to vector<1xf32>
    %299 = vector.shape_cast %298 : vector<1xf32> to vector<1x1x1x1xf32>
    %300 = vector.extract %299[0, 0, 0, 0] : f32 from vector<1x1x1x1xf32>
    %301 = vector.broadcast %300 : f32 to vector<1x1x1xf32>
    %cst_108 = arith.constant 5.120000e+02 : f32
    %302 = vector.broadcast %cst_108 : f32 to vector<1x1x1xf32>
    %303 = arith.divf %301, %302 : vector<1x1x1xf32>
    %304 = vector.broadcast %303 : vector<1x1x1xf32> to vector<2x2x128xf32>
    %305 = arith.subf %242, %304 : vector<2x2x128xf32>
    %306 = vector.broadcast %303 : vector<1x1x1xf32> to vector<2x2x128xf32>
    %307 = arith.subf %242, %306 : vector<2x2x128xf32>
    %308 = arith.mulf %305, %307 : vector<2x2x128xf32>
    %309 = vector.shape_cast %308 : vector<2x2x128xf32> to vector<1x2x2x128xf32>
    %cst_109 = arith.constant dense<0.000000e+00> : vector<1xf32>
    %310 = vector.multi_reduction <add>, %309, %cst_109 [1, 2, 3] : vector<1x2x2x128xf32> to vector<1xf32>
    %311 = vector.shape_cast %310 : vector<1xf32> to vector<1x1x1x1xf32>
    %312 = vector.extract %311[0, 0, 0, 0] : f32 from vector<1x1x1x1xf32>
    %313 = vector.broadcast %312 : f32 to vector<1x1x1xf32>
    %cst_110 = arith.constant 5.120000e+02 : f32
    %314 = vector.broadcast %cst_110 : f32 to vector<1x1x1xf32>
    %315 = arith.divf %313, %314 : vector<1x1x1xf32>
    %316 = vector.broadcast %303 : vector<1x1x1xf32> to vector<2x2x128xf32>
    %317 = arith.subf %242, %316 : vector<2x2x128xf32>
    %cst_111 = arith.constant 9.99999974E-6 : f32
    %318 = vector.broadcast %cst_111 : f32 to vector<1x1x1xf32>
    %319 = arith.addf %315, %318 : vector<1x1x1xf32>
    %320 = math.rsqrt %319 : vector<1x1x1xf32>
    %321 = vector.broadcast %320 : vector<1x1x1xf32> to vector<2x2x128xf32>
    %322 = arith.mulf %317, %321 : vector<2x2x128xf32>
    %c0_112 = arith.constant 0 : index
    %323 = memref.load %arg8[%c0_112] : memref<4xf32, #tpu.memory_space<smem>>
    %324 = vector.broadcast %323 : f32 to vector<2x2x128xf32>
    %325 = arith.mulf %322, %324 : vector<2x2x128xf32>
    %c0_113 = arith.constant 0 : index
    %326 = memref.load %arg9[%c0_113] : memref<4xf32, #tpu.memory_space<smem>>
    %327 = vector.broadcast %326 : f32 to vector<2x2x128xf32>
    %328 = arith.addf %325, %327 : vector<2x2x128xf32>
    %329 = vector.shape_cast %260 : vector<2x2x128xf32> to vector<1x2x2x128xf32>
    %cst_114 = arith.constant dense<0.000000e+00> : vector<1xf32>
    %330 = vector.multi_reduction <add>, %329, %cst_114 [1, 2, 3] : vector<1x2x2x128xf32> to vector<1xf32>
    %331 = vector.shape_cast %330 : vector<1xf32> to vector<1x1x1x1xf32>
    %332 = vector.extract %331[0, 0, 0, 0] : f32 from vector<1x1x1x1xf32>
    %333 = vector.broadcast %332 : f32 to vector<1x1x1xf32>
    %cst_115 = arith.constant 5.120000e+02 : f32
    %334 = vector.broadcast %cst_115 : f32 to vector<1x1x1xf32>
    %335 = arith.divf %333, %334 : vector<1x1x1xf32>
    %336 = vector.broadcast %335 : vector<1x1x1xf32> to vector<2x2x128xf32>
    %337 = arith.subf %260, %336 : vector<2x2x128xf32>
    %338 = vector.broadcast %335 : vector<1x1x1xf32> to vector<2x2x128xf32>
    %339 = arith.subf %260, %338 : vector<2x2x128xf32>
    %340 = arith.mulf %337, %339 : vector<2x2x128xf32>
    %341 = vector.shape_cast %340 : vector<2x2x128xf32> to vector<1x2x2x128xf32>
    %cst_116 = arith.constant dense<0.000000e+00> : vector<1xf32>
    %342 = vector.multi_reduction <add>, %341, %cst_116 [1, 2, 3] : vector<1x2x2x128xf32> to vector<1xf32>
    %343 = vector.shape_cast %342 : vector<1xf32> to vector<1x1x1x1xf32>
    %344 = vector.extract %343[0, 0, 0, 0] : f32 from vector<1x1x1x1xf32>
    %345 = vector.broadcast %344 : f32 to vector<1x1x1xf32>
    %cst_117 = arith.constant 5.120000e+02 : f32
    %346 = vector.broadcast %cst_117 : f32 to vector<1x1x1xf32>
    %347 = arith.divf %345, %346 : vector<1x1x1xf32>
    %348 = vector.broadcast %335 : vector<1x1x1xf32> to vector<2x2x128xf32>
    %349 = arith.subf %260, %348 : vector<2x2x128xf32>
    %cst_118 = arith.constant 9.99999974E-6 : f32
    %350 = vector.broadcast %cst_118 : f32 to vector<1x1x1xf32>
    %351 = arith.addf %347, %350 : vector<1x1x1xf32>
    %352 = math.rsqrt %351 : vector<1x1x1xf32>
    %353 = vector.broadcast %352 : vector<1x1x1xf32> to vector<2x2x128xf32>
    %354 = arith.mulf %349, %353 : vector<2x2x128xf32>
    %c1_119 = arith.constant 1 : index
    %355 = memref.load %arg8[%c1_119] : memref<4xf32, #tpu.memory_space<smem>>
    %356 = vector.broadcast %355 : f32 to vector<2x2x128xf32>
    %357 = arith.mulf %354, %356 : vector<2x2x128xf32>
    %c1_120 = arith.constant 1 : index
    %358 = memref.load %arg9[%c1_120] : memref<4xf32, #tpu.memory_space<smem>>
    %359 = vector.broadcast %358 : f32 to vector<2x2x128xf32>
    %360 = arith.addf %357, %359 : vector<2x2x128xf32>
    %361 = vector.shape_cast %278 : vector<2x2x128xf32> to vector<1x2x2x128xf32>
    %cst_121 = arith.constant dense<0.000000e+00> : vector<1xf32>
    %362 = vector.multi_reduction <add>, %361, %cst_121 [1, 2, 3] : vector<1x2x2x128xf32> to vector<1xf32>
    %363 = vector.shape_cast %362 : vector<1xf32> to vector<1x1x1x1xf32>
    %364 = vector.extract %363[0, 0, 0, 0] : f32 from vector<1x1x1x1xf32>
    %365 = vector.broadcast %364 : f32 to vector<1x1x1xf32>
    %cst_122 = arith.constant 5.120000e+02 : f32
    %366 = vector.broadcast %cst_122 : f32 to vector<1x1x1xf32>
    %367 = arith.divf %365, %366 : vector<1x1x1xf32>
    %368 = vector.broadcast %367 : vector<1x1x1xf32> to vector<2x2x128xf32>
    %369 = arith.subf %278, %368 : vector<2x2x128xf32>
    %370 = vector.broadcast %367 : vector<1x1x1xf32> to vector<2x2x128xf32>
    %371 = arith.subf %278, %370 : vector<2x2x128xf32>
    %372 = arith.mulf %369, %371 : vector<2x2x128xf32>
    %373 = vector.shape_cast %372 : vector<2x2x128xf32> to vector<1x2x2x128xf32>
    %cst_123 = arith.constant dense<0.000000e+00> : vector<1xf32>
    %374 = vector.multi_reduction <add>, %373, %cst_123 [1, 2, 3] : vector<1x2x2x128xf32> to vector<1xf32>
    %375 = vector.shape_cast %374 : vector<1xf32> to vector<1x1x1x1xf32>
    %376 = vector.extract %375[0, 0, 0, 0] : f32 from vector<1x1x1x1xf32>
    %377 = vector.broadcast %376 : f32 to vector<1x1x1xf32>
    %cst_124 = arith.constant 5.120000e+02 : f32
    %378 = vector.broadcast %cst_124 : f32 to vector<1x1x1xf32>
    %379 = arith.divf %377, %378 : vector<1x1x1xf32>
    %380 = vector.broadcast %367 : vector<1x1x1xf32> to vector<2x2x128xf32>
    %381 = arith.subf %278, %380 : vector<2x2x128xf32>
    %cst_125 = arith.constant 9.99999974E-6 : f32
    %382 = vector.broadcast %cst_125 : f32 to vector<1x1x1xf32>
    %383 = arith.addf %379, %382 : vector<1x1x1xf32>
    %384 = math.rsqrt %383 : vector<1x1x1xf32>
    %385 = vector.broadcast %384 : vector<1x1x1xf32> to vector<2x2x128xf32>
    %386 = arith.mulf %381, %385 : vector<2x2x128xf32>
    %c2_126 = arith.constant 2 : index
    %387 = memref.load %arg8[%c2_126] : memref<4xf32, #tpu.memory_space<smem>>
    %388 = vector.broadcast %387 : f32 to vector<2x2x128xf32>
    %389 = arith.mulf %386, %388 : vector<2x2x128xf32>
    %c2_127 = arith.constant 2 : index
    %390 = memref.load %arg9[%c2_127] : memref<4xf32, #tpu.memory_space<smem>>
    %391 = vector.broadcast %390 : f32 to vector<2x2x128xf32>
    %392 = arith.addf %389, %391 : vector<2x2x128xf32>
    %393 = vector.shape_cast %296 : vector<2x2x128xf32> to vector<1x2x2x128xf32>
    %cst_128 = arith.constant dense<0.000000e+00> : vector<1xf32>
    %394 = vector.multi_reduction <add>, %393, %cst_128 [1, 2, 3] : vector<1x2x2x128xf32> to vector<1xf32>
    %395 = vector.shape_cast %394 : vector<1xf32> to vector<1x1x1x1xf32>
    %396 = vector.extract %395[0, 0, 0, 0] : f32 from vector<1x1x1x1xf32>
    %397 = vector.broadcast %396 : f32 to vector<1x1x1xf32>
    %cst_129 = arith.constant 5.120000e+02 : f32
    %398 = vector.broadcast %cst_129 : f32 to vector<1x1x1xf32>
    %399 = arith.divf %397, %398 : vector<1x1x1xf32>
    %400 = vector.broadcast %399 : vector<1x1x1xf32> to vector<2x2x128xf32>
    %401 = arith.subf %296, %400 : vector<2x2x128xf32>
    %402 = vector.broadcast %399 : vector<1x1x1xf32> to vector<2x2x128xf32>
    %403 = arith.subf %296, %402 : vector<2x2x128xf32>
    %404 = arith.mulf %401, %403 : vector<2x2x128xf32>
    %405 = vector.shape_cast %404 : vector<2x2x128xf32> to vector<1x2x2x128xf32>
    %cst_130 = arith.constant dense<0.000000e+00> : vector<1xf32>
    %406 = vector.multi_reduction <add>, %405, %cst_130 [1, 2, 3] : vector<1x2x2x128xf32> to vector<1xf32>
    %407 = vector.shape_cast %406 : vector<1xf32> to vector<1x1x1x1xf32>
    %408 = vector.extract %407[0, 0, 0, 0] : f32 from vector<1x1x1x1xf32>
    %409 = vector.broadcast %408 : f32 to vector<1x1x1xf32>
    %cst_131 = arith.constant 5.120000e+02 : f32
    %410 = vector.broadcast %cst_131 : f32 to vector<1x1x1xf32>
    %411 = arith.divf %409, %410 : vector<1x1x1xf32>
    %412 = vector.broadcast %399 : vector<1x1x1xf32> to vector<2x2x128xf32>
    %413 = arith.subf %296, %412 : vector<2x2x128xf32>
    %cst_132 = arith.constant 9.99999974E-6 : f32
    %414 = vector.broadcast %cst_132 : f32 to vector<1x1x1xf32>
    %415 = arith.addf %411, %414 : vector<1x1x1xf32>
    %416 = math.rsqrt %415 : vector<1x1x1xf32>
    %417 = vector.broadcast %416 : vector<1x1x1xf32> to vector<2x2x128xf32>
    %418 = arith.mulf %413, %417 : vector<2x2x128xf32>
    %c3_133 = arith.constant 3 : index
    %419 = memref.load %arg8[%c3_133] : memref<4xf32, #tpu.memory_space<smem>>
    %420 = vector.broadcast %419 : f32 to vector<2x2x128xf32>
    %421 = arith.mulf %418, %420 : vector<2x2x128xf32>
    %c3_134 = arith.constant 3 : index
    %422 = memref.load %arg9[%c3_134] : memref<4xf32, #tpu.memory_space<smem>>
    %423 = vector.broadcast %422 : f32 to vector<2x2x128xf32>
    %424 = arith.addf %421, %423 : vector<2x2x128xf32>
    %425 = arith.addf %328, %2 : vector<2x2x128xf32>
    %cst_135 = arith.constant 0.000000e+00 : f32
    %cst_136 = arith.constant 6.000000e+00 : f32
    %426 = vector.broadcast %cst_135 : f32 to vector<2x2x128xf32>
    %427 = arith.maximumf %426, %425 : vector<2x2x128xf32>
    %428 = vector.broadcast %cst_136 : f32 to vector<2x2x128xf32>
    %429 = arith.minimumf %428, %427 : vector<2x2x128xf32>
    %430 = arith.addf %360, %4 : vector<2x2x128xf32>
    %cst_137 = arith.constant 0.000000e+00 : f32
    %cst_138 = arith.constant 6.000000e+00 : f32
    %431 = vector.broadcast %cst_137 : f32 to vector<2x2x128xf32>
    %432 = arith.maximumf %431, %430 : vector<2x2x128xf32>
    %433 = vector.broadcast %cst_138 : f32 to vector<2x2x128xf32>
    %434 = arith.minimumf %433, %432 : vector<2x2x128xf32>
    %435 = arith.addf %392, %6 : vector<2x2x128xf32>
    %cst_139 = arith.constant 0.000000e+00 : f32
    %cst_140 = arith.constant 6.000000e+00 : f32
    %436 = vector.broadcast %cst_139 : f32 to vector<2x2x128xf32>
    %437 = arith.maximumf %436, %435 : vector<2x2x128xf32>
    %438 = vector.broadcast %cst_140 : f32 to vector<2x2x128xf32>
    %439 = arith.minimumf %438, %437 : vector<2x2x128xf32>
    %440 = arith.addf %424, %8 : vector<2x2x128xf32>
    %cst_141 = arith.constant 0.000000e+00 : f32
    %cst_142 = arith.constant 6.000000e+00 : f32
    %441 = vector.broadcast %cst_141 : f32 to vector<2x2x128xf32>
    %442 = arith.maximumf %441, %440 : vector<2x2x128xf32>
    %443 = vector.broadcast %cst_142 : f32 to vector<2x2x128xf32>
    %444 = arith.minimumf %443, %442 : vector<2x2x128xf32>
    %445 = vector.shape_cast %429 : vector<2x2x128xf32> to vector<2x1x2x128xf32>
    %446 = vector.shape_cast %434 : vector<2x2x128xf32> to vector<2x1x2x128xf32>
    %447 = vector.shape_cast %439 : vector<2x2x128xf32> to vector<2x1x2x128xf32>
    %448 = vector.shape_cast %444 : vector<2x2x128xf32> to vector<2x1x2x128xf32>
    %449 = tpu.concatenate %445, %446, %447, %448 in 1 : vector<2x1x2x128xf32>, vector<2x1x2x128xf32>, vector<2x1x2x128xf32>, vector<2x1x2x128xf32> -> vector<2x4x2x128xf32>
    %c0_143 = arith.constant 0 : index
    %c0_144 = arith.constant 0 : index
    %c0_145 = arith.constant 0 : index
    %c0_146 = arith.constant 0 : index
    %450 = vector.load %arg10[%c0_143, %c0_144, %c0_145, %c0_146] : memref<2x4x2x128xf32, #tpu.memory_space<vmem>>, vector<2x4x2x128xf32>
    tpu.vector_store %arg10[%c0_143, %c0_144, %c0_145, %c0_146], %449 {strides = array<i32>} : memref<2x4x2x128xf32, #tpu.memory_space<vmem>>, vector<2x4x2x128xf32>,
    return
  }
  func.func @transform_0(%arg0: i32) -> (i32, i32, i32, i32) {
    %c0_i32 = arith.constant 0 : i32
    %c0_i32_0 = arith.constant 0 : i32
    %c0_i32_1 = arith.constant 0 : i32
    %c0_i32_2 = arith.constant 0 : i32
    %c0_i32_3 = arith.constant 0 : i32
    return %c0_i32, %c0_i32_0, %c0_i32_1, %c0_i32_2 : i32, i32, i32, i32
  }
  func.func @transform_1(%arg0: i32) -> (i32, i32) {
    %c0_i32 = arith.constant 0 : i32
    %c0_i32_0 = arith.constant 0 : i32
    %c0_i32_1 = arith.constant 0 : i32
    return %c0_i32, %c0_i32_0 : i32, i32
  }
  func.func @transform_2(%arg0: i32) -> i32 {
    %c0_i32 = arith.constant 0 : i32
    %c0_i32_0 = arith.constant 0 : i32
    return %c0_i32 : i32
  }
  func.func @transform_3(%arg0: i32) -> i32 {
    %c0_i32 = arith.constant 0 : i32
    %c0_i32_0 = arith.constant 0 : i32
    return %c0_i32 : i32
  }
  func.func @transform_4(%arg0: i32) -> i32 {
    %c0_i32 = arith.constant 0 : i32
    %c0_i32_0 = arith.constant 0 : i32
    return %c0_i32 : i32
  }
  func.func @transform_5(%arg0: i32) -> (i32, i32) {
    %c0_i32 = arith.constant 0 : i32
    %c0_i32_0 = arith.constant 0 : i32
    %c0_i32_1 = arith.constant 0 : i32
    return %c0_i32, %c0_i32_0 : i32, i32
  }
  func.func @transform_6(%arg0: i32) -> i32 {
    %c0_i32 = arith.constant 0 : i32
    %c0_i32_0 = arith.constant 0 : i32
    return %c0_i32 : i32
  }
  func.func @transform_7(%arg0: i32) -> i32 {
    %c0_i32 = arith.constant 0 : i32
    %c0_i32_0 = arith.constant 0 : i32
    return %c0_i32 : i32
  }
  func.func @transform_8(%arg0: i32) -> i32 {
    %c0_i32 = arith.constant 0 : i32
    %c0_i32_0 = arith.constant 0 : i32
    return %c0_i32 : i32
  }
  func.func @transform_9(%arg0: i32) -> (i32, i32, i32, i32) {
    %c0_i32 = arith.constant 0 : i32
    %c0_i32_0 = arith.constant 0 : i32
    %c0_i32_1 = arith.constant 0 : i32
    %c0_i32_2 = arith.constant 0 : i32
    %c0_i32_3 = arith.constant 0 : i32
    return %c0_i32, %c0_i32_0, %c0_i32_1, %c0_i32_2 : i32, i32, i32, i32
  }
}

</mosaic_0001>

<bundles_post_ra>
// kernel: basic_block.1
= control target key start
LH: loop header
LB: loop body
LE: loop exit
PB: predicated region body
PF: predicated region fallthrough
CT: control target
= control target key end

     0   :  { %14 = vsyncpa [#allocation3], 0  ;;  %s1373_s0 = inlined_call_operand.vmem [shape: f32[2,4,2,128], index: 0, kind: input, shape index: {}]   ;;  %s1374_s1 = inlined_call_operand.vmem [shape: f32[4,4], index: 1, kind: input, shape index: {}]   ;;  %s1375_s2 = inlined_call_operand.vmem [shape: f32[4], index: 2, kind: input, shape index: {}]   ;;  %s1376_s3 = inlined_call_operand.vmem [shape: f32[4], index: 3, kind: input, shape index: {}]   ;;  %s1377_s4 = inlined_call_operand.vmem [shape: f32[4], index: 4, kind: input, shape index: {}]   ;;  %s1378_s5 = inlined_call_operand.vmem [shape: f32[4,4], index: 5, kind: input, shape index: {}]   ;;  %s1379_s6 = inlined_call_operand.vmem [shape: f32[4], index: 6, kind: input, shape index: {}]   ;;  %s1380_s7 = inlined_call_operand.vmem [shape: f32[4], index: 7, kind: input, shape index: {}]   ;;  %s1381_s8 = inlined_call_operand.vmem [shape: f32[4], index: 8, kind: input, shape index: {}]   ;;  %s1382_s9 = inlined_call_operand.vmem [shape: f32[2,4,2,128], index: 9, kind: output, shape index: {}]  }
   0x1   :  { %15 = vsyncpa [#allocation5], 0 }
   0x2   :  { %16 = vsyncpa [#allocation8], 0 }
   0x3   :  { %17 = vsyncpa [#allocation11], 0  ;;  %s37_s11 = sshll.u32 %s1375_s2, 4  ;;  %s38_s11 = int_to_ptr.vmem [resolvable:$true] %s37_s11 }
   0x4   :  { %18 = vsyncpa [#allocation14], 0  ;;  %s57_s14 = sshll.u32 %s1377_s4, 4  ;;  %s863_s15 = scalar_lea.vmem %s38_s11, 16  ;;  %s58_s14 = int_to_ptr.vmem [resolvable:$true] %s57_s14 }
   0x5   :  { %p864_p0 = scmp.ne.s32.totalorder %s38_s11, %s863_s15  ;;  %p868_p1 = scmp.lt.s32.totalorder %s38_s11, %s38_s11 }
   0x6   :  { %p869_p2 = scmp.lt.s32.totalorder %s863_s15, %s863_s15 }
   0x8   :  { %p870_p3 = por %p869_p2, %p868_p1 }
   0xa   :  { %p871_p4 = pnand %p870_p3, %p864_p0 }
   0xc   :  { %874 = shalt.err (!%p871_p4)
}
   0xd   :  { %s969_s16 = smov [#allocation4]   ;;  %s875_s17 = scalar_lea.vmem %s58_s14, 16 }
   0xe   :  { %40 = dma.vmem_to_smem %s38_s11, 16, %s969_s16, [#allocation5]  }
   0xf   :  { %p876_p5 = scmp.ne.s32.totalorder %s58_s14, %s875_s17  ;;  %p880_p6 = scmp.lt.s32.totalorder %s58_s14, %s58_s14 }
  0x10   :  { %p881_p7 = scmp.lt.s32.totalorder %s875_s17, %s875_s17 }
  0x12   :  { %p882_p8 = por %p881_p7, %p880_p6 }
  0x14   :  { %p883_p9 = pnand %p882_p8, %p876_p5 }
  0x16   :  { %886 = shalt.err (!%p883_p9)
}
  0x17   :  { %s970_s2 = smov [#allocation7]   ;;  %s77_s19 = sshll.u32 %s1379_s6, 4  ;;  %s78_s19 = int_to_ptr.vmem [resolvable:$true] %s77_s19 }
  0x18   :  { %60 = dma.vmem_to_smem %s58_s14, 16, %s970_s2, [#allocation8]  }
  0x19   :  { %s27_s22 = sshll.u32 %s1374_s1, 4  ;;  %s887_s23 = scalar_lea.vmem %s78_s19, 16  ;;  %s28_s22 = int_to_ptr.vmem [resolvable:$true] %s27_s22 }
  0x1a   :  { %p888_p10 = scmp.ne.s32.totalorder %s78_s19, %s887_s23  ;;  %p892_p11 = scmp.lt.s32.totalorder %s78_s19, %s78_s19 }
  0x1b   :  { %p893_p12 = scmp.lt.s32.totalorder %s887_s23, %s887_s23 }
  0x1d   :  { %p894_p13 = por %p893_p12, %p892_p11 }
  0x1f   :  { %p895_p0 = pnand %p894_p13, %p888_p10 }
  0x21   :  { %898 = shalt.err (!%p895_p0)
}
  0x22   :  { %s971_s24 = smov [#allocation10]   ;;  %s899_s25 = scalar_lea.vmem %s28_s22, 64 }
  0x23   :  { %80 = dma.vmem_to_smem %s78_s19, 16, %s971_s24, [#allocation11]  }
  0x24   :  { %p900_p1 = scmp.ne.s32.totalorder %s28_s22, %s899_s25  ;;  %p904_p2 = scmp.lt.s32.totalorder %s28_s22, %s28_s22 }
  0x25   :  { %p905_p3 = scmp.lt.s32.totalorder %s899_s25, %s899_s25 }
  0x27   :  { %p906_p4 = por %p905_p3, %p904_p2 }
  0x29   :  { %p907_p5 = pnand %p906_p4, %p900_p1 }
  0x2b   :  { %910 = shalt.err (!%p907_p5)
}
  0x2c   :  { %s972_s6 = smov [#allocation2]   ;;  %s47_s27 = sshll.u32 %s1376_s3, 4  ;;  %s48_s27 = int_to_ptr.vmem [resolvable:$true] %s47_s27 }
  0x2d   :  { %30 = dma.vmem_to_smem %s28_s22, 64, %s972_s6, [#allocation3]  }
  0x2e   :  { %s67_s30 = sshll.u32 %s1378_s5, 4  ;;  %s911_s10 = scalar_lea.vmem %s48_s27, 16  ;;  %s68_s30 = int_to_ptr.vmem [resolvable:$true] %s67_s30 }
  0x2f   :  { %p912_p6 = scmp.ne.s32.totalorder %s48_s27, %s911_s10  ;;  %p916_p7 = scmp.lt.s32.totalorder %s48_s27, %s48_s27 }
  0x30   :  { %p917_p8 = scmp.lt.s32.totalorder %s911_s10, %s911_s10 }
  0x32   :  { %p918_p9 = por %p917_p8, %p916_p7 }
  0x34   :  { %p919_p10 = pnand %p918_p9, %p912_p6 }
  0x36   :  { %922 = shalt.err (!%p919_p10)
}
  0x37   :  { %s973_s11 = smov [#allocation6]   ;;  %s923_s12 = scalar_lea.vmem %s68_s30, 64 }
  0x38   :  { %50 = dma.vmem_to_smem %s48_s27, 16, %s973_s11, [#allocation5]  }
  0x39   :  { %p924_p11 = scmp.ne.s32.totalorder %s68_s30, %s923_s12  ;;  %p928_p12 = scmp.lt.s32.totalorder %s68_s30, %s68_s30 }
  0x3a   :  { %p929_p13 = scmp.lt.s32.totalorder %s923_s12, %s923_s12 }
  0x3c   :  { %p930_p0 = por %p929_p13, %p928_p12 }
  0x3e   :  { %p931_p1 = pnand %p930_p0, %p924_p11 }
  0x40   :  { %934 = shalt.err (!%p931_p1)
}
  0x41   :  { %s974_s3 = smov [#allocation9]   ;;  %s87_s14 = sshll.u32 %s1380_s7, 4  ;;  %s88_s14 = int_to_ptr.vmem [resolvable:$true] %s87_s14 }
  0x42   :  { %70 = dma.vmem_to_smem %s68_s30, 64, %s974_s3, [#allocation8]  }
  0x43   :  { %s97_s17 = sshll.u32 %s1381_s8, 4  ;;  %s935_s2 = scalar_lea.vmem %s88_s14, 16  ;;  %s98_s17 = int_to_ptr.vmem [resolvable:$true] %s97_s17 }
  0x44   :  { %p936_p2 = scmp.ne.s32.totalorder %s88_s14, %s935_s2  ;;  %p940_p3 = scmp.lt.s32.totalorder %s88_s14, %s88_s14 }
  0x45   :  { %p941_p4 = scmp.lt.s32.totalorder %s935_s2, %s935_s2 }
  0x47   :  { %p942_p5 = por %p941_p4, %p940_p3 }
  0x49   :  { %p943_p6 = pnand %p942_p5, %p936_p2 }
  0x4b   :  { %946 = shalt.err (!%p943_p6)
}
  0x4c   :  { %s975_s4 = smov [#allocation12]   ;;  %s947_s18 = scalar_lea.vmem %s98_s17, 16 }
  0x4d   :  { %90 = dma.vmem_to_smem %s88_s14, 16, %s975_s4, [#allocation11]  }
  0x4e   :  { %p948_p7 = scmp.ne.s32.totalorder %s98_s17, %s947_s18  ;;  %p952_p8 = scmp.lt.s32.totalorder %s98_s17, %s98_s17 }
  0x4f   :  { %p953_p9 = scmp.lt.s32.totalorder %s947_s18, %s947_s18 }
  0x51   :  { %p954_p10 = por %p953_p9, %p952_p8 }
  0x53   :  { %p955_p11 = pnand %p954_p10, %p948_p7 }
  0x55   :  { %958 = shalt.err (!%p955_p11)
}
  0x56   :  { %s976_s7 = smov [#allocation13]  }
  0x57   :  { %100 = dma.vmem_to_smem %s98_s17, 16, %s976_s7, [#allocation14]  }
  0x58   :  { %959 = dma.done.wait [#allocation3], 64  }
  0x59   :  { %960 = vsyncadd [#allocation3], 4294967232 }
  0x5a   :  { %961 = dma.done.wait [#allocation5], 32  }
  0x5b   :  { %962 = vsyncadd [#allocation5], 4294967264 }
  0x5c   :  { %963 = dma.done.wait [#allocation8], 80  }
  0x5d   :  { %964 = vsyncadd [#allocation8], 4294967216 }
  0x5e   :  { %965 = dma.done.wait [#allocation11], 32  }
  0x5f   :  { %966 = vsyncadd [#allocation11], 4294967264 }
  0x60   :  { %967 = dma.done.wait [#allocation14], 16  }
  0x61   :  { %968 = vsyncadd [#allocation14], 4294967280 }
  0x62   :  { %125 = sfence }
  0x63   :  { %s134_s8 = sld [smem:[#allocation2]]  ;;  %s753_s20 = sld [smem:[#allocation2 + $0x1]]  ;;  %v1054_v0 = vld [vmem:[%s1373_s0] sm:$0x3]  ;;  %v1059_v1 = vld [vmem:[%s1373_s0 + $0x8] sm:$0x3] }
  0x64   :  { %s138_s19 = sld [smem:[#allocation4]]  ;;  %s754_s21 = sld [smem:[#allocation2 + $0x2]]  ;;  %v1064_v2 = vld [vmem:[%s1373_s0 + $0x2] sm:$0x3]  ;;  %v1069_v3 = vld [vmem:[%s1373_s0 + $0xa] sm:$0x3] }
  0x65   :  { %s755_s22 = sld [smem:[#allocation2 + $0x3]]  ;;  %v1074_v4 = vld [vmem:[%s1373_s0 + $0x4] sm:$0x3]  ;;  %v1079_v5 = vld [vmem:[%s1373_s0 + $0xc] sm:$0x3]  ;;  %vm238_vm0 = vcmask 1041408  }
  0x66   :  { %v1086_v11 = vld [vmem:[%s1373_s0 + $0x6] sm:$0x3]  ;;  %v1091_v12 = vld [vmem:[%s1373_s0 + $0xe] sm:$0x3]  ;;  %s756_s14 = sld [smem:[#allocation2 + $0x80]]  ;;  %s757_s15 = sld [smem:[#allocation4 + $0x1]] }
  0x67   :  { %s758_s16 = sld [smem:[#allocation2 + $0x81]]  ;;  %s759_s17 = sld [smem:[#allocation2 + $0x82]] }
  0x68   :  { %s760_s2 = sld [smem:[#allocation2 + $0x83]]  ;;  %s761_s18 = sld [smem:[#allocation2 + $0x100]] }
  0x69   :  { %v135_v6 = vstv %s134_s8  ;;  %v143_v10 = vstv %s753_s20  ;;  %s762_s7 = sld [smem:[#allocation4 + $0x2]]  ;;  %s763_s8 = sld [smem:[#allocation2 + $0x101]] }
  0x6a   :  { %v136_v7 = vmul.f32 %v135_v6, %v1054_v0  ;;  %v137_v8 = vmul.f32 %v135_v6, %v1059_v1  ;;  %v139_v9 = vstv %s138_s19  ;;  %v144_v13 = vmul.f32 %v143_v10, %v1064_v2  ;;  %s764_s19 = sld [smem:[#allocation2 + $0x102]]  ;;  %s765_s20 = sld [smem:[#allocation2 + $0x103]] }
  0x6b   :  { %v145_v14 = vmul.f32 %v143_v10, %v1069_v3  ;;  %v149_v15 = vstv %s754_s21  ;;  %v155_v16 = vstv %s755_s22  ;;  %s766_s23 = sld [smem:[#allocation2 + $0x180]]  ;;  %s767_s24 = sld [smem:[#allocation4 + $0x3]] }
  0x6c   :  { %v140_v17 = vadd.f32 %v139_v9, %v136_v7  ;;  %v141_v18 = vadd.f32 %v139_v9, %v137_v8  ;;  %v150_v19 = vmul.f32 %v149_v15, %v1074_v4  ;;  %v151_v20 = vmul.f32 %v149_v15, %v1079_v5  ;;  %s768_s25 = sld [smem:[#allocation2 + $0x181]]  ;;  %s769_s6 = sld [smem:[#allocation2 + $0x182]] }
  0x6d   :  { %v156_v23 = vmul.f32 %v155_v16, %v1086_v11  ;;  %v157_v24 = vmul.f32 %v155_v16, %v1091_v12  ;;  %v161_v32 = vstv %s756_s14  ;;  %v165_v35 = vstv %s757_s15  ;;  %s770_s1 = sld [smem:[#allocation2 + $0x183]]  ;;  %s276_s26 = sld [smem:[#allocation6]] }
  0x6e   :  { %v146_v21 = vadd.f32 %v144_v13, %v140_v17  ;;  %v147_v22 = vadd.f32 %v145_v14, %v141_v18  ;;  %v162_v33 = vmul.f32 %v161_v32, %v1054_v0  ;;  %v163_v34 = vmul.f32 %v161_v32, %v1059_v1  ;;  %s280_s27 = sld [smem:[#allocation7]]  ;;  %s771_s30 = sld [smem:[#allocation6 + $0x1]] }
  0x6f   :  { %v169_v36 = vstv %s758_s16  ;;  %v175_v41 = vstv %s759_s17  ;;  %v181_v46 = vstv %s760_s2  ;;  %v187_v16 = vstv %s761_s18  ;;  %s1186_s10 = sld [smem:[#allocation9]]  ;;  %s1192_s12 = sld [smem:[#allocation7 + $0x1]] }
  0x70   :  { %v152_v25 = vadd.f32 %v150_v19, %v146_v21  ;;  %v153_v26 = vadd.f32 %v151_v20, %v147_v22  ;;  %v166_v37 = vadd.f32 %v165_v35, %v162_v33  ;;  %v167_v38 = vadd.f32 %v165_v35, %v163_v34  ;;  %s1190_s11 = sld [smem:[#allocation9 + $0x80]]  ;;  %s1200_s14 = sld [smem:[#allocation10 + $0x1]] }
  0x71   :  { %v170_v39 = vmul.f32 %v169_v36, %v1064_v2  ;;  %v171_v40 = vmul.f32 %v169_v36, %v1069_v3  ;;  %v176_v44 = vmul.f32 %v175_v41, %v1074_v4  ;;  %v177_v45 = vmul.f32 %v175_v41, %v1079_v5  ;;  %s1194_s3 = sld [smem:[#allocation9 + $0x100]]  ;;  %s1202_s15 = sld [smem:[#allocation10 + $0x2]] }
  0x72   :  { %v158_v27 = vadd.f32 %v156_v23, %v152_v25  ;;  %v159_v28 = vadd.f32 %v157_v24, %v153_v26  ;;  %v182_v49 = vmul.f32 %v181_v46, %v1086_v11  ;;  %v183_v50 = vmul.f32 %v181_v46, %v1091_v12  ;;  %s1196_s5 = sld [smem:[#allocation10]]  ;;  %s1204_s16 = sld [smem:[#allocation10 + $0x3]] }
  0x73   :  { %v172_v42 = vadd.f32 %v170_v39, %v166_v37  ;;  %v173_v43 = vadd.f32 %v171_v40, %v167_v38  ;;  %v188_v17 = vmul.f32 %v187_v16, %v1054_v0  ;;  %v189_v18 = vmul.f32 %v187_v16, %v1059_v1  ;;  %s1198_s13 = sld [smem:[#allocation9 + $0x180]]  ;;  %s1207_s17 = sld [smem:[#allocation9 + $0x1]] }
  0x74   :  { %v239_v29 = vsel %vm238_vm0, %v158_v27, 0.0  ;;  %v240_v30 = vsel %vm238_vm0, %v159_v28, 0.0  ;;  %v191_v19 = vstv %s762_s7  ;;  %v195_v20 = vstv %s763_s8  ;;  %s1209_s2 = sld [smem:[#allocation9 + $0x81]] }
  0x75   :  { %v241_v31 = vadd.f32 %v240_v30, %v239_v29  ;;  %v178_v47 = vadd.f32 %v176_v44, %v172_v42  ;;  %v179_v48 = vadd.f32 %v177_v45, %v173_v43  ;;  %v192_v21 = vadd.f32 %v191_v19, %v188_v17  ;;  %s1216_s18 = sld [smem:[#allocation9 + $0x181]] }
  0x76   :  { %v193_v22 = vadd.f32 %v191_v19, %v189_v18  ;;  %v196_v23 = vmul.f32 %v195_v20, %v1064_v2  ;;  %v197_v24 = vmul.f32 %v195_v20, %v1069_v3  ;;  %v201_v25 = vstv %s764_s19  ;;  %s773_s19 = sld [smem:[#allocation6 + $0x2]] }
  0x77   :  { %242 = vadd.xlane.f32.xlu0 %v241_v31  ;;  %v1109_v51 = vadd.f32 %v182_v49, %v178_v47  ;;  %v1111_v52 = vadd.f32 %v183_v50, %v179_v48  ;;  %v203_v29 = vmul.f32 %v201_v25, %v1079_v5  ;;  %v207_v30 = vstv %s765_s20  ;;  %s774_s20 = sld [smem:[#allocation7 + $0x2]] }
  0x78   :  { %v198_v26 = vadd.f32 %v196_v23, %v192_v21  ;;  %v208_v33 = vmul.f32 %v207_v30, %v1086_v11  ;;  %v209_v34 = vmul.f32 %v207_v30, %v1091_v12  ;;  %v227_v18 = vstv %s769_s6  ;;  %s775_s6 = sld [smem:[#allocation6 + $0x3]] }
  0x79   :  { %v288_v53 = vsel %vm238_vm0, %v1109_v51, 0.0  ;;  %v289_v54 = vsel %vm238_vm0, %v1111_v52, 0.0  ;;  %v228_v21 = vmul.f32 %v227_v18, %v1074_v4  ;;  %v233_v23 = vstv %s770_s1  ;;  %s776_s1 = sld [smem:[#allocation7 + $0x3]] }
  0x7a   :  { %v290_v55 = vadd.f32 %v289_v54, %v288_v53 }
  0x7c   :  { %291 = vadd.xlane.f32.xlu1 %v290_v55 }
 0x104   :  { %v243_v56 = vpop.xlane.xlu0 %242 }
 0x105   :  { %v244_v57 = vrot.slane %v243_v56, 4 }
 0x107   :  { %v245_v58 = vadd.f32 %v244_v57, %v243_v56 }
 0x109   :  { %v246_v59 = vrot.slane %v245_v58, 2  ;;  %v292_v40 = vpop.xlane.xlu1 %291 }
 0x10a   :  { %v293_v41 = vrot.slane %v292_v40, 4 }
 0x10b   :  { %v247_v60 = vadd.f32 %v246_v59, %v245_v58 }
 0x10c   :  { %v294_v42 = vadd.f32 %v293_v41, %v292_v40 }
 0x10d   :  { %v248_v61 = vrot.slane %v247_v60, 1 }
 0x10e   :  { %v295_v43 = vrot.slane %v294_v42, 2 }
 0x10f   :  { %v249_v62 = vadd.f32 %v248_v61, %v247_v60 }
 0x110   :  { %v296_v47 = vadd.f32 %v295_v43, %v294_v42 }
 0x111   :  { %801 = vpush %v249_v62 }
 0x112   :  { %v297_v50 = vrot.slane %v296_v47, 1 }
 0x114   :  { %v298_v55 = vadd.f32 %v297_v50, %v296_v47 }
 0x142   :  { %s802_s4 = spop %801 }
 0x143   :  { %v251_v63 = vstv %s802_s4  ;;  %s1214_s4 = sld [smem:[#allocation9 + $0x101]] }
 0x144   :  { %v253_v6 = vmul.f32 0.001953125, %v251_v63 }
 0x146   :  { %v1117_v7 = vsub.f32 %v158_v27, %v253_v6  ;;  %v1119_v8 = vsub.f32 %v159_v28, %v253_v6  ;;  %v199_v27 = vadd.f32 %v197_v24, %v193_v22  ;;  %v202_v28 = vmul.f32 %v201_v25, %v1074_v4 }
 0x147   :  { %v229_v22 = vmul.f32 %v227_v18, %v1079_v5 }
 0x148   :  { %v256_v9 = vmul.f32 %v1117_v7, %v1117_v7  ;;  %v257_v10 = vmul.f32 %v1119_v8, %v1119_v8  ;;  %v204_v31 = vadd.f32 %v202_v28, %v198_v26  ;;  %v205_v32 = vadd.f32 %v203_v29, %v199_v27 }
 0x149   :  { %v234_v26 = vmul.f32 %v233_v23, %v1086_v11  ;;  %v235_v27 = vmul.f32 %v233_v23, %v1091_v12 }
 0x14a   :  { %v258_v13 = vsel %vm238_vm0, %v256_v9, 0.0  ;;  %v259_v14 = vsel %vm238_vm0, %v257_v10, 0.0  ;;  %v1135_v35 = vadd.f32 %v208_v33, %v204_v31  ;;  %v1137_v36 = vadd.f32 %v209_v34, %v205_v32 }
 0x14b   :  { %v260_v15 = vadd.f32 %v259_v14, %v258_v13  ;;  %v217_v10 = vstv %s767_s24  ;;  %v221_v13 = vstv %s768_s25  ;;  %s793_s24 = sld [smem:[#allocation9 + $0x182]] }
 0x14c   :  { %v336_v37 = vsel %vm238_vm0, %v1135_v35, 0.0  ;;  %v337_v38 = vsel %vm238_vm0, %v1137_v36, 0.0  ;;  %v222_v16 = vmul.f32 %v221_v13, %v1064_v2  ;;  %v223_v17 = vmul.f32 %v221_v13, %v1069_v3 }
 0x14d   :  { %261 = vadd.xlane.f32.xlu0 %v260_v15  ;;  %v338_v39 = vadd.f32 %v337_v38, %v336_v37 }
 0x151   :  { %339 = vadd.xlane.f32.xlu0 %v338_v39 }
 0x1da   :  { %v262_v44 = vpop.xlane.xlu0 %261 }
 0x1db   :  { %v263_v45 = vrot.slane %v262_v44, 4 }
 0x1dd   :  { %v264_v46 = vadd.f32 %v263_v45, %v262_v44 }
 0x1de   :  { %v340_v5 = vpop.xlane.xlu0 %339 }
 0x1df   :  { %v265_v48 = vrot.slane %v264_v46, 2  ;;  %v341_v30 = vrot.slane %v340_v5, 4 }
 0x1e1   :  { %v266_v49 = vadd.f32 %v265_v48, %v264_v46  ;;  %v342_v31 = vadd.f32 %v341_v30, %v340_v5  ;;  %v489_v5 = vstv %s1202_s15 }
 0x1e3   :  { %v267_v53 = vrot.slane %v266_v49, 1  ;;  %v343_v32 = vrot.slane %v342_v31, 2 }
 0x1e5   :  { %v268_v54 = vadd.f32 %v267_v53, %v266_v49  ;;  %v344_v34 = vadd.f32 %v343_v32, %v342_v31  ;;  %v277_v49 = vstv %s276_s26  ;;  %s779_s26 = sld [smem:[#allocation9 + $0x3]] }
 0x1e7   :  { %803 = vpush %v268_v54  ;;  %v345_v39 = vrot.slane %v344_v34, 1 }
 0x1e8   :  { %805 = vpush %v298_v55 }
 0x1e9   :  { %v346_v42 = vadd.f32 %v345_v39, %v344_v34  ;;  %v441_v39 = vstv %s1207_s17 }
 0x218   :  { %s1143_s21 = spop %803 }
 0x219   :  { %s806_s22 = spop %805  ;;  %v270_v43 = vstv %s1143_s21  ;;  %s778_s21 = sld [smem:[#allocation9 + $0x2]] }
 0x21a   :  { %v300_v56 = vstv %s806_s22  ;;  %v271_v44 = vmul.f32 0.001953125, %v270_v43  ;;  %s783_s22 = sld [smem:[#allocation9 + $0x82]] }
 0x21b   :  { %v301_v57 = vmul.f32 0.001953125, %v300_v56 }
 0x21c   :  { %v272_v45 = vadd.f32 1e-05, %v271_v44  ;;  %v493_v44 = vstv %s1214_s4  ;;  %s796_s4 = sld [smem:[#allocation13 + $0x1]] }
 0x21d   :  { %v1146_v58 = vsub.f32 %v1109_v51, %v301_v57  ;;  %v1149_v59 = vsub.f32 %v1111_v52, %v301_v57  ;;  %v213_v51 = vstv %s766_s23  ;;  %s788_s23 = sld [smem:[#allocation9 + $0x102]] }
 0x21e   :  { %v214_v52 = vmul.f32 %v213_v51, %v1054_v0  ;;  %v215_v9 = vmul.f32 %v213_v51, %v1059_v1  ;;  %841 = vrsqrt.f32 %v272_v45  ;;  %v519_v45 = vstv %s1216_s18 }
 0x21f   :  { %v304_v60 = vmul.f32 %v1146_v58, %v1146_v58  ;;  %v305_v61 = vmul.f32 %v1149_v59, %v1149_v59 }
 0x220   :  { %v218_v14 = vadd.f32 %v217_v10, %v214_v52  ;;  %v219_v15 = vadd.f32 %v217_v10, %v215_v9 }
 0x221   :  { %v306_v62 = vsel %vm238_vm0, %v304_v60, 0.0  ;;  %v307_v63 = vsel %vm238_vm0, %v305_v61, 0.0  ;;  %v281_v60 = vstv %s280_s27  ;;  %s784_s27 = sld [smem:[#allocation9 + $0x83]] }
 0x222   :  { %v308_v6 = vadd.f32 %v307_v63, %v306_v62  ;;  %v224_v19 = vadd.f32 %v222_v16, %v218_v14  ;;  %v225_v20 = vadd.f32 %v223_v17, %v219_v15  ;;  %v325_v16 = vstv %s771_s30 }
 0x223   :  { %v433_v17 = vstv %s1186_s10 }
 0x224   :  { %309 = vadd.xlane.f32.xlu1 %v308_v6  ;;  %v230_v24 = vadd.f32 %v228_v21, %v224_v19  ;;  %v231_v25 = vadd.f32 %v229_v22, %v225_v20  ;;  %v459_v20 = vstv %s1190_s11  ;;  %v329_v21 = vstv %s1192_s12  ;;  %s572_s12 = sld [smem:[#allocation12]] }
 0x226   :  { %v1165_v28 = vadd.f32 %v234_v26, %v230_v24  ;;  %v1167_v29 = vadd.f32 %v235_v27, %v231_v25  ;;  %v485_v25 = vstv %s1194_s3  ;;  %v437_v27 = vstv %s1196_s5  ;;  %s576_s3 = sld [smem:[#allocation13]]  ;;  %s799_s5 = sld [smem:[#allocation12 + $0x3]] }
 0x228   :  { %v384_v2 = vsel %vm238_vm0, %v1165_v28, 0.0  ;;  %v385_v3 = vsel %vm238_vm0, %v1167_v29, 0.0  ;;  %v842_v46 = vpop.eup %841 }
 0x229   :  { %v386_v4 = vadd.f32 %v385_v3, %v384_v2  ;;  %v274_v47 = vmul.f32 %v842_v46, %v1117_v7  ;;  %v275_v48 = vmul.f32 %v842_v46, %v1119_v8 }
 0x22b   :  { %387 = vadd.xlane.f32.xlu0 %v386_v4  ;;  %v278_v55 = vmul.f32 %v277_v49, %v274_v47  ;;  %v279_v57 = vmul.f32 %v277_v49, %v275_v48  ;;  %v463_v4 = vstv %s1200_s14 }
 0x22d   :  { %v282_v7 = vadd.f32 %v281_v60, %v278_v55  ;;  %v283_v51 = vadd.f32 %v281_v60, %v279_v57 }
 0x22f   :  { %v284_v9 = vmax.f32 %v282_v7, 0.0  ;;  %v285_v10 = vmax.f32 %v283_v51, 0.0 }
 0x231   :  { %v286_v13 = vmin.f32 %v284_v9, 6.0  ;;  %v287_v15 = vmin.f32 %v285_v10, 6.0 }
 0x233   :  { %v434_v24 = vmul.f32 %v433_v17, %v286_v13  ;;  %v435_v26 = vmul.f32 %v433_v17, %v287_v15  ;;  %v460_v2 = vmul.f32 %v459_v20, %v286_v13  ;;  %v461_v30 = vmul.f32 %v459_v20, %v287_v15 }
 0x234   :  { %v486_v31 = vmul.f32 %v485_v25, %v286_v13  ;;  %v487_v32 = vmul.f32 %v485_v25, %v287_v15 }
 0x235   :  { %v438_v34 = vadd.f32 %v437_v27, %v434_v24  ;;  %v465_v46 = vadd.f32 %v463_v4, %v461_v30 }
 0x236   :  { %v490_v47 = vadd.f32 %v489_v5, %v486_v31  ;;  %v491_v48 = vadd.f32 %v489_v5, %v487_v32 }
 0x2b1   :  { %v310_v11 = vpop.xlane.xlu1 %309 }
 0x2b2   :  { %v311_v33 = vrot.slane %v310_v11, 4 }
 0x2b4   :  { %v312_v12 = vadd.f32 %v311_v33, %v310_v11  ;;  %v515_v11 = vstv %s1204_s16 }
 0x2b6   :  { %v313_v37 = vrot.slane %v312_v12, 2 }
 0x2b8   :  { %v314_v38 = vadd.f32 %v313_v37, %v312_v12 }
 0x2ba   :  { %v315_v40 = vrot.slane %v314_v38, 1 }
 0x2bc   :  { %v316_v41 = vadd.f32 %v315_v40, %v314_v38  ;;  %v439_v38 = vadd.f32 %v437_v27, %v435_v26  ;;  %v464_v40 = vadd.f32 %v463_v4, %v460_v2 }
 0x2be   :  { %807 = vpush %v316_v41  ;;  %v467_v41 = vstv %s1209_s2  ;;  %s795_s2 = sld [smem:[#allocation12 + $0x1]] }
 0x2bf   :  { %809 = vpush %v346_v42 }
 0x2ef   :  { %s808_s28 = spop %807 }
 0x2f0   :  { %v318_v50 = vstv %s808_s28  ;;  %s810_s29 = spop %809  ;;  %s789_s28 = sld [smem:[#allocation9 + $0x103]] }
 0x2f1   :  { %v319_v53 = vmul.f32 0.001953125, %v318_v50  ;;  %v348_v54 = vstv %s810_s29  ;;  %s794_s29 = sld [smem:[#allocation9 + $0x183]] }
 0x2f2   :  { %v349_v56 = vmul.f32 0.001953125, %v348_v54 }
 0x2f3   :  { %v320_v61 = vadd.f32 1e-05, %v319_v53 }
 0x2f4   :  { %v1177_v62 = vsub.f32 %v1135_v35, %v349_v56  ;;  %v1180_v63 = vsub.f32 %v1137_v36, %v349_v56 }
 0x2f5   :  { %843 = vrsqrt.f32 %v320_v61 }
 0x2f6   :  { %v352_v8 = vmul.f32 %v1177_v62, %v1177_v62  ;;  %v353_v6 = vmul.f32 %v1180_v63, %v1180_v63 }
 0x2f8   :  { %v354_v52 = vsel %vm238_vm0, %v352_v8, 0.0  ;;  %v355_v35 = vsel %vm238_vm0, %v353_v6, 0.0 }
 0x2f9   :  { %v356_v36 = vadd.f32 %v355_v35, %v354_v52 }
 0x2fb   :  { %357 = vadd.xlane.f32.xlu1 %v356_v36 }
 0x2ff   :  { %v844_v14 = vpop.eup %843 }
 0x300   :  { %v322_v18 = vmul.f32 %v844_v14, %v1146_v58  ;;  %v323_v19 = vmul.f32 %v844_v14, %v1149_v59  ;;  %v511_v58 = vstv %s1198_s13  ;;  %v388_v14 = vpop.xlane.xlu0 %387  ;;  %s800_s13 = sld [smem:[#allocation13 + $0x3]] }
 0x301   :  { %v512_v37 = vmul.f32 %v511_v58, %v286_v13  ;;  %v513_v49 = vmul.f32 %v511_v58, %v287_v15  ;;  %v389_v15 = vrot.slane %v388_v14, 4 }
 0x302   :  { %v326_v22 = vmul.f32 %v325_v16, %v322_v18  ;;  %v327_v23 = vmul.f32 %v325_v16, %v323_v19 }
 0x303   :  { %v516_v60 = vadd.f32 %v515_v11, %v512_v37  ;;  %v517_v36 = vadd.f32 %v515_v11, %v513_v49  ;;  %v390_v16 = vadd.f32 %v389_v15, %v388_v14  ;;  %v499_v49 = vstv %s788_s23 }
 0x304   :  { %v330_v3 = vadd.f32 %v329_v21, %v326_v22  ;;  %v331_v59 = vadd.f32 %v329_v21, %v327_v23 }
 0x305   :  { %v391_v17 = vrot.slane %v390_v16, 2 }
 0x306   :  { %v332_v33 = vmax.f32 %v330_v3, 0.0  ;;  %v333_v12 = vmax.f32 %v331_v59, 0.0 }
 0x307   :  { %v392_v21 = vadd.f32 %v391_v17, %v390_v16 }
 0x308   :  { %v334_v42 = vmin.f32 %v332_v33, 6.0  ;;  %v335_v43 = vmin.f32 %v333_v12, 6.0 }
 0x309   :  { %v393_v24 = vrot.slane %v392_v21, 1 }
 0x30a   :  { %v442_v50 = vmul.f32 %v441_v39, %v334_v42  ;;  %v443_v53 = vmul.f32 %v441_v39, %v335_v43  ;;  %v468_v54 = vmul.f32 %v467_v41, %v334_v42  ;;  %v469_v55 = vmul.f32 %v467_v41, %v335_v43 }
 0x30b   :  { %v494_v56 = vmul.f32 %v493_v44, %v334_v42  ;;  %v495_v57 = vmul.f32 %v493_v44, %v335_v43  ;;  %v520_v61 = vmul.f32 %v519_v45, %v334_v42  ;;  %v521_v9 = vmul.f32 %v519_v45, %v335_v43 }
 0x30c   :  { %v1229_v7 = vadd.f32 %v442_v50, %v438_v34  ;;  %v1231_v8 = vadd.f32 %v443_v53, %v439_v38  ;;  %v1233_v6 = vadd.f32 %v468_v54, %v464_v40  ;;  %v1235_v51 = vadd.f32 %v469_v55, %v465_v46 }
 0x30d   :  { %v1237_v52 = vadd.f32 %v494_v56, %v490_v47  ;;  %v1239_v35 = vadd.f32 %v495_v57, %v491_v48  ;;  %v1241_v10 = vadd.f32 %v520_v61, %v516_v60  ;;  %v1243_v13 = vadd.f32 %v521_v9, %v517_v36 }
 0x30e   :  { %v394_v27 = vadd.f32 %v393_v24, %v392_v21  ;;  %v373_v34 = vstv %s773_s19  ;;  %v377_v38 = vstv %s774_s20  ;;  %v447_v45 = vstv %s778_s21 }
 0x30f   :  { %v473_v46 = vstv %s783_s22  ;;  %v525_v50 = vstv %s793_s24 }
 0x388   :  { %v358_v18 = vpop.xlane.xlu1 %357 }
 0x389   :  { %v359_v19 = vrot.slane %v358_v18, 4 }
 0x38b   :  { %v360_v20 = vadd.f32 %v359_v19, %v358_v18 }
 0x38d   :  { %v361_v22 = vrot.slane %v360_v20, 2 }
 0x38f   :  { %v362_v23 = vadd.f32 %v361_v22, %v360_v20 }
 0x391   :  { %v363_v25 = vrot.slane %v362_v23, 1 }
 0x393   :  { %v364_v26 = vadd.f32 %v363_v25, %v362_v23  ;;  %v425_v25 = vstv %s776_s1  ;;  %s798_s1 = sld [smem:[#allocation13 + $0x2]] }
 0x395   :  { %811 = vpush %v364_v26 }
 0x396   :  { %813 = vpush %v394_v27 }
 0x3c6   :  { %s812_s7 = spop %811 }
 0x3c7   :  { %v366_v2 = vstv %s812_s7  ;;  %s814_s8 = spop %813 }
 0x3c8   :  { %v367_v58 = vmul.f32 0.001953125, %v366_v2  ;;  %v396_v3 = vstv %s814_s8 }
 0x3c9   :  { %v397_v59 = vmul.f32 0.001953125, %v396_v3 }
 0x3ca   :  { %v368_v4 = vadd.f32 1e-05, %v367_v58 }
 0x3cb   :  { %v1246_v5 = vsub.f32 %v1165_v28, %v397_v59  ;;  %v1249_v30 = vsub.f32 %v1167_v29, %v397_v59 }
 0x3cc   :  { %845 = vrsqrt.f32 %v368_v4  ;;  %v453_v4 = vstv %s779_s26 }
 0x3cd   :  { %v400_v31 = vmul.f32 %v1246_v5, %v1246_v5  ;;  %v401_v32 = vmul.f32 %v1249_v30, %v1249_v30 }
 0x3cf   :  { %v402_v11 = vsel %vm238_vm0, %v400_v31, 0.0  ;;  %v403_v33 = vsel %vm238_vm0, %v401_v32, 0.0  ;;  %v479_v31 = vstv %s784_s27 }
 0x3d0   :  { %v404_v12 = vadd.f32 %v403_v33, %v402_v11  ;;  %v505_v33 = vstv %s789_s28 }
 0x3d2   :  { %405 = vadd.xlane.f32.xlu1 %v404_v12 }
 0x3d6   :  { %v846_v28 = vpop.eup %845 }
 0x3d7   :  { %v370_v29 = vmul.f32 %v846_v28, %v1177_v62  ;;  %v371_v37 = vmul.f32 %v846_v28, %v1180_v63 }
 0x3d9   :  { %v374_v39 = vmul.f32 %v373_v34, %v370_v29  ;;  %v375_v40 = vmul.f32 %v373_v34, %v371_v37  ;;  %v531_v37 = vstv %s794_s29 }
 0x3db   :  { %v378_v41 = vadd.f32 %v377_v38, %v374_v39  ;;  %v379_v42 = vadd.f32 %v377_v38, %v375_v40 }
 0x3dd   :  { %v380_v43 = vmax.f32 %v378_v41, 0.0  ;;  %v381_v44 = vmax.f32 %v379_v42, 0.0 }
 0x3df   :  { %v382_v47 = vmin.f32 %v380_v43, 6.0  ;;  %v383_v48 = vmin.f32 %v381_v44, 6.0 }
 0x3e1   :  { %v448_v53 = vmul.f32 %v447_v45, %v382_v47  ;;  %v449_v54 = vmul.f32 %v447_v45, %v383_v48  ;;  %v474_v62 = vmul.f32 %v473_v46, %v382_v47  ;;  %v475_v55 = vmul.f32 %v473_v46, %v383_v48 }
 0x3e2   :  { %v500_v63 = vmul.f32 %v499_v49, %v382_v47  ;;  %v501_v56 = vmul.f32 %v499_v49, %v383_v48  ;;  %v526_v57 = vmul.f32 %v525_v50, %v382_v47  ;;  %v527_v60 = vmul.f32 %v525_v50, %v383_v48 }
 0x3e3   :  { %v450_v61 = vadd.f32 %v448_v53, %v1229_v7  ;;  %v451_v36 = vadd.f32 %v449_v54, %v1231_v8  ;;  %v476_v9 = vadd.f32 %v474_v62, %v1233_v6  ;;  %v477_v14 = vadd.f32 %v475_v55, %v1235_v51 }
 0x3e4   :  { %v502_v15 = vadd.f32 %v500_v63, %v1237_v52  ;;  %v503_v16 = vadd.f32 %v501_v56, %v1239_v35  ;;  %v528_v17 = vadd.f32 %v526_v57, %v1241_v10  ;;  %v529_v18 = vadd.f32 %v527_v60, %v1243_v13 }
 0x3e5   :  { %v421_v35 = vstv %s775_s6  ;;  %s797_s6 = sld [smem:[#allocation12 + $0x2]] }
 0x45f   :  { %v406_v19 = vpop.xlane.xlu1 %405 }
 0x460   :  { %v407_v20 = vrot.slane %v406_v19, 4 }
 0x462   :  { %v408_v21 = vadd.f32 %v407_v20, %v406_v19 }
 0x464   :  { %v409_v22 = vrot.slane %v408_v21, 2 }
 0x466   :  { %v410_v23 = vadd.f32 %v409_v22, %v408_v21 }
 0x468   :  { %v411_v7 = vrot.slane %v410_v23, 1 }
 0x46a   :  { %v412_v24 = vadd.f32 %v411_v7, %v410_v23 }
 0x46c   :  { %815 = vpush %v412_v24 }
 0x49d   :  { %s816_s25 = spop %815 }
 0x49e   :  { %v414_v8 = vstv %s816_s25 }
 0x49f   :  { %v415_v6 = vmul.f32 0.001953125, %v414_v8 }
 0x4a1   :  { %v416_v51 = vadd.f32 1e-05, %v415_v6 }
 0x4a3   :  { %847 = vrsqrt.f32 %v416_v51 }
 0x4ad   :  { %v848_v52 = vpop.eup %847 }
 0x4ae   :  { %v418_v10 = vmul.f32 %v848_v52, %v1246_v5  ;;  %v419_v13 = vmul.f32 %v848_v52, %v1249_v30 }
 0x4b0   :  { %v422_v26 = vmul.f32 %v421_v35, %v418_v10  ;;  %v423_v27 = vmul.f32 %v421_v35, %v419_v13 }
 0x4b2   :  { %v426_v2 = vadd.f32 %v425_v25, %v422_v26  ;;  %v427_v58 = vadd.f32 %v425_v25, %v423_v27 }
 0x4b4   :  { %v428_v3 = vmax.f32 %v426_v2, 0.0  ;;  %v429_v59 = vmax.f32 %v427_v58, 0.0 }
 0x4b6   :  { %v430_v32 = vmin.f32 %v428_v3, 6.0  ;;  %v431_v11 = vmin.f32 %v429_v59, 6.0 }
 0x4b8   :  { %v454_v12 = vmul.f32 %v453_v4, %v430_v32  ;;  %v455_v28 = vmul.f32 %v453_v4, %v431_v11  ;;  %v480_v34 = vmul.f32 %v479_v31, %v430_v32  ;;  %v481_v5 = vmul.f32 %v479_v31, %v431_v11 }
 0x4b9   :  { %v506_v29 = vmul.f32 %v505_v33, %v430_v32  ;;  %v507_v30 = vmul.f32 %v505_v33, %v431_v11  ;;  %v532_v45 = vmul.f32 %v531_v37, %v430_v32  ;;  %v533_v46 = vmul.f32 %v531_v37, %v431_v11 }
 0x4ba   :  { %v456_v38 = vadd.f32 %v454_v12, %v450_v61  ;;  %v457_v39 = vadd.f32 %v455_v28, %v451_v36  ;;  %v1269_v40 = vadd.f32 %v480_v34, %v476_v9  ;;  %v1271_v41 = vadd.f32 %v481_v5, %v477_v14 }
 0x4bb   :  { %v1279_v49 = vadd.f32 %v506_v29, %v502_v15  ;;  %v1281_v50 = vadd.f32 %v507_v30, %v503_v16  ;;  %v1287_v55 = vadd.f32 %v532_v45, %v528_v17  ;;  %v1289_v63 = vadd.f32 %v533_v46, %v529_v18 }
 0x4bc   :  { %v536_v42 = vsel %vm238_vm0, %v456_v38, 0.0  ;;  %v537_v43 = vsel %vm238_vm0, %v457_v39, 0.0  ;;  %v580_v47 = vsel %vm238_vm0, %v1269_v40, 0.0  ;;  %v581_v48 = vsel %vm238_vm0, %v1271_v41, 0.0 }
 0x4bd   :  { %v538_v44 = vadd.f32 %v537_v43, %v536_v42  ;;  %v582_v53 = vadd.f32 %v581_v48, %v580_v47  ;;  %v624_v54 = vsel %vm238_vm0, %v1279_v49, 0.0  ;;  %v625_v62 = vsel %vm238_vm0, %v1281_v50, 0.0 }
 0x4be   :  { %v626_v56 = vadd.f32 %v625_v62, %v624_v54  ;;  %v668_v57 = vsel %vm238_vm0, %v1287_v55, 0.0  ;;  %v669_v60 = vsel %vm238_vm0, %v1289_v63, 0.0  ;;  %v573_v42 = vstv %s572_s12 }
 0x4bf   :  { %539 = vadd.xlane.f32.xlu0 %v538_v44  ;;  %v670_v61 = vadd.f32 %v669_v60, %v668_v57  ;;  %v577_v44 = vstv %s576_s3 }
 0x4c3   :  { %583 = vadd.xlane.f32.xlu0 %v582_v53 }
 0x4c7   :  { %627 = vadd.xlane.f32.xlu0 %v626_v56 }
 0x4cb   :  { %671 = vadd.xlane.f32.xlu0 %v670_v61 }
 0x54c   :  { %v540_v36 = vpop.xlane.xlu0 %539 }
 0x54d   :  { %v541_v9 = vrot.slane %v540_v36, 4 }
 0x54f   :  { %v542_v14 = vadd.f32 %v541_v9, %v540_v36 }
 0x550   :  { %v584_v51 = vpop.xlane.xlu0 %583 }
 0x551   :  { %v543_v15 = vrot.slane %v542_v14, 2  ;;  %v585_v52 = vrot.slane %v584_v51, 4 }
 0x553   :  { %v544_v16 = vadd.f32 %v543_v15, %v542_v14  ;;  %v586_v35 = vadd.f32 %v585_v52, %v584_v51 }
 0x554   :  { %v628_v61 = vpop.xlane.xlu0 %627 }
 0x555   :  { %v545_v17 = vrot.slane %v544_v16, 1  ;;  %v587_v10 = vrot.slane %v586_v35, 2  ;;  %v629_v36 = vrot.slane %v628_v61, 4 }
 0x557   :  { %v546_v19 = vadd.f32 %v545_v17, %v544_v16  ;;  %v588_v27 = vadd.f32 %v587_v10, %v586_v35  ;;  %v630_v9 = vadd.f32 %v629_v36, %v628_v61 }
 0x559   :  { %817 = vpush %v546_v19  ;;  %v589_v3 = vrot.slane %v588_v27, 1  ;;  %v631_v14 = vrot.slane %v630_v9, 2 }
 0x55b   :  { %v590_v31 = vadd.f32 %v589_v3, %v588_v27  ;;  %v617_v27 = vstv %s795_s2 }
 0x58a   :  { %s818_s30 = spop %817 }
 0x58b   :  { %v548_v18 = vstv %s818_s30 }
 0x58c   :  { %v549_v20 = vmul.f32 0.001953125, %v548_v18 }
 0x58e   :  { %v550_v21 = vsub.f32 %v456_v38, %v549_v20  ;;  %v551_v22 = vsub.f32 %v457_v39, %v549_v20 }
 0x590   :  { %v552_v23 = vmul.f32 %v550_v21, %v550_v21  ;;  %v553_v7 = vmul.f32 %v551_v22, %v551_v22 }
 0x592   :  { %v554_v24 = vsel %vm238_vm0, %v552_v23, 0.0  ;;  %v555_v8 = vsel %vm238_vm0, %v553_v7, 0.0 }
 0x593   :  { %v556_v6 = vadd.f32 %v555_v8, %v554_v24 }
 0x595   :  { %557 = vadd.xlane.f32.xlu1 %v556_v6 }
 0x622   :  { %v558_v13 = vpop.xlane.xlu1 %557 }
 0x623   :  { %v559_v25 = vrot.slane %v558_v13, 4 }
 0x625   :  { %v560_v26 = vadd.f32 %v559_v25, %v558_v13 }
 0x627   :  { %v561_v2 = vrot.slane %v560_v26, 2 }
 0x629   :  { %v562_v58 = vadd.f32 %v561_v2, %v560_v26 }
 0x62b   :  { %v563_v59 = vrot.slane %v562_v58, 1 }
 0x62d   :  { %v564_v4 = vadd.f32 %v563_v59, %v562_v58  ;;  %v621_v58 = vstv %s796_s4 }
 0x62f   :  { %819 = vpush %v564_v4 }
 0x630   :  { %821 = vpush %v590_v31 }
 0x660   :  { %s820_s10 = spop %819 }
 0x661   :  { %v566_v32 = vstv %s820_s10  ;;  %s822_s11 = spop %821 }
 0x662   :  { %v567_v11 = vmul.f32 0.001953125, %v566_v32  ;;  %v592_v33 = vstv %s822_s11  ;;  %v857_v32 = vld [vmem:[%s1373_s0 + $0x2] sm:$0x3] }
 0x663   :  { %v593_v12 = vmul.f32 0.001953125, %v592_v33  ;;  %v858_v33 = vld [vmem:[%s1373_s0 + $0xa] sm:$0x3] }
 0x664   :  { %v568_v28 = vadd.f32 1e-05, %v567_v11 }
 0x665   :  { %v1298_v34 = vsub.f32 %v1269_v40, %v593_v12  ;;  %v1301_v5 = vsub.f32 %v1271_v41, %v593_v12 }
 0x666   :  { %849 = vrsqrt.f32 %v568_v28 }
 0x667   :  { %v596_v29 = vmul.f32 %v1298_v34, %v1298_v34  ;;  %v597_v30 = vmul.f32 %v1301_v5, %v1301_v5 }
 0x669   :  { %v598_v37 = vsel %vm238_vm0, %v596_v29, 0.0  ;;  %v599_v38 = vsel %vm238_vm0, %v597_v30, 0.0 }
 0x66a   :  { %v600_v39 = vadd.f32 %v599_v38, %v598_v37 }
 0x66c   :  { %601 = vadd.xlane.f32.xlu1 %v600_v39 }
 0x670   :  { %v850_v40 = vpop.eup %849 }
 0x671   :  { %v570_v43 = vmul.f32 %v850_v40, %v550_v21  ;;  %v571_v41 = vmul.f32 %v850_v40, %v551_v22 }
 0x673   :  { %v574_v45 = vmul.f32 %v573_v42, %v570_v43  ;;  %v575_v46 = vmul.f32 %v573_v42, %v571_v41 }
 0x675   :  { %v578_v47 = vadd.f32 %v577_v44, %v574_v45  ;;  %v579_v48 = vadd.f32 %v577_v44, %v575_v46 }
 0x677   :  { %v712_v53 = vadd.f32 %v578_v47, %v1054_v0  ;;  %v713_v54 = vadd.f32 %v579_v48, %v1059_v1  ;;  %v632_v1 = vadd.f32 %v631_v14, %v630_v9 }
 0x679   :  { %v714_v62 = vmax.f32 %v712_v53, 0.0  ;;  %v715_v56 = vmax.f32 %v713_v54, 0.0  ;;  %v633_v18 = vrot.slane %v632_v1, 1 }
 0x67b   :  { %v716_v57 = vmin.f32 %v714_v62, 6.0  ;;  %v717_v60 = vmin.f32 %v715_v56, 6.0  ;;  %v634_v22 = vadd.f32 %v633_v18, %v632_v1 }
 0x67d   :  { %736 = vst [vmem:[%s1382_s9] sm:$0x3] %v716_v57  ;;  %740 = vst [vmem:[%s1382_s9 + $0x8] sm:$0x3] %v717_v60 }
 0x6f9   :  { %v602_v15 = vpop.xlane.xlu1 %601 }
 0x6fa   :  { %v603_v0 = vrot.slane %v602_v15, 4 }
 0x6fc   :  { %v604_v16 = vadd.f32 %v603_v0, %v602_v15 }
 0x6fe   :  { %v605_v17 = vrot.slane %v604_v16, 2 }
 0x700   :  { %v606_v19 = vadd.f32 %v605_v17, %v604_v16  ;;  %v661_v17 = vstv %s797_s6 }
 0x702   :  { %v607_v20 = vrot.slane %v606_v19, 1 }
 0x704   :  { %v608_v21 = vadd.f32 %v607_v20, %v606_v19 }
 0x706   :  { %823 = vpush %v608_v21 }
 0x707   :  { %825 = vpush %v634_v22 }
 0x737   :  { %s824_s16 = spop %823 }
 0x738   :  { %v610_v23 = vstv %s824_s16  ;;  %s826_s17 = spop %825 }
 0x739   :  { %v611_v7 = vmul.f32 0.001953125, %v610_v23  ;;  %v636_v24 = vstv %s826_s17  ;;  %v859_v23 = vld [vmem:[%s1373_s0 + $0x4] sm:$0x3] }
 0x73a   :  { %v637_v8 = vmul.f32 0.001953125, %v636_v24  ;;  %v860_v24 = vld [vmem:[%s1373_s0 + $0xc] sm:$0x3] }
 0x73b   :  { %v612_v6 = vadd.f32 1e-05, %v611_v7 }
 0x73c   :  { %v1318_v51 = vsub.f32 %v1279_v49, %v637_v8  ;;  %v1321_v52 = vsub.f32 %v1281_v50, %v637_v8 }
 0x73d   :  { %851 = vrsqrt.f32 %v612_v6 }
 0x73e   :  { %v640_v35 = vmul.f32 %v1318_v51, %v1318_v51  ;;  %v641_v10 = vmul.f32 %v1321_v52, %v1321_v52 }
 0x740   :  { %v642_v13 = vsel %vm238_vm0, %v640_v35, 0.0  ;;  %v643_v25 = vsel %vm238_vm0, %v641_v10, 0.0 }
 0x741   :  { %v644_v26 = vadd.f32 %v643_v25, %v642_v13 }
 0x743   :  { %645 = vadd.xlane.f32.xlu1 %v644_v26 }
 0x747   :  { %v852_v49 = vpop.eup %851 }
 0x748   :  { %v614_v50 = vmul.f32 %v852_v49, %v1298_v34  ;;  %v615_v2 = vmul.f32 %v852_v49, %v1301_v5  ;;  %v672_v5 = vpop.xlane.xlu0 %671 }
 0x749   :  { %v673_v37 = vrot.slane %v672_v5, 4 }
 0x74a   :  { %v618_v3 = vmul.f32 %v617_v27, %v614_v50  ;;  %v619_v59 = vmul.f32 %v617_v27, %v615_v2 }
 0x74b   :  { %v674_v38 = vadd.f32 %v673_v37, %v672_v5  ;;  %v862_v5 = vld [vmem:[%s1373_s0 + $0xe] sm:$0x3] }
 0x74c   :  { %v622_v4 = vadd.f32 %v621_v58, %v618_v3  ;;  %v623_v31 = vadd.f32 %v621_v58, %v619_v59 }
 0x74d   :  { %v675_v39 = vrot.slane %v674_v38, 2 }
 0x74e   :  { %v718_v11 = vadd.f32 %v857_v32, %v622_v4  ;;  %v719_v12 = vadd.f32 %v858_v33, %v623_v31  ;;  %v705_v4 = vstv %s799_s5 }
 0x74f   :  { %v676_v41 = vadd.f32 %v675_v39, %v674_v38 }
 0x750   :  { %v720_v28 = vmax.f32 %v718_v11, 0.0  ;;  %v721_v29 = vmax.f32 %v719_v12, 0.0  ;;  %v709_v11 = vstv %s800_s13 }
 0x751   :  { %v677_v46 = vrot.slane %v676_v41, 1 }
 0x752   :  { %v722_v34 = vmin.f32 %v720_v28, 6.0  ;;  %v723_v30 = vmin.f32 %v721_v29, 6.0 }
 0x753   :  { %v678_v53 = vadd.f32 %v677_v46, %v676_v41 }
 0x754   :  { %737 = vst [vmem:[%s1382_s9 + $0x2] sm:$0x3] %v722_v34  ;;  %741 = vst [vmem:[%s1382_s9 + $0xa] sm:$0x3] %v723_v30  ;;  %v861_v34 = vld [vmem:[%s1373_s0 + $0x6] sm:$0x3] }
 0x7d0   :  { %v646_v40 = vpop.xlane.xlu1 %645 }
 0x7d1   :  { %v647_v42 = vrot.slane %v646_v40, 4 }
 0x7d3   :  { %v648_v43 = vadd.f32 %v647_v42, %v646_v40 }
 0x7d5   :  { %v649_v44 = vrot.slane %v648_v43, 2 }
 0x7d7   :  { %v650_v45 = vadd.f32 %v649_v44, %v648_v43 }
 0x7d9   :  { %v651_v47 = vrot.slane %v650_v45, 1 }
 0x7db   :  { %v652_v48 = vadd.f32 %v651_v47, %v650_v45 }
 0x7dd   :  { %827 = vpush %v652_v48 }
 0x7de   :  { %829 = vpush %v678_v53 }
 0x80e   :  { %s828_s24 = spop %827 }
 0x80f   :  { %v654_v54 = vstv %s828_s24  ;;  %s830_s25 = spop %829 }
 0x810   :  { %v655_v62 = vmul.f32 0.001953125, %v654_v54  ;;  %v680_v56 = vstv %s830_s25 }
 0x811   :  { %v681_v57 = vmul.f32 0.001953125, %v680_v56 }
 0x812   :  { %v656_v60 = vadd.f32 1e-05, %v655_v62 }
 0x813   :  { %v682_v61 = vsub.f32 %v1287_v55, %v681_v57  ;;  %v683_v36 = vsub.f32 %v1289_v63, %v681_v57  ;;  %v665_v55 = vstv %s798_s1 }
 0x814   :  { %853 = vrsqrt.f32 %v656_v60 }
 0x815   :  { %v684_v9 = vmul.f32 %v682_v61, %v682_v61  ;;  %v685_v14 = vmul.f32 %v683_v36, %v683_v36 }
 0x817   :  { %v686_v15 = vsel %vm238_vm0, %v684_v9, 0.0  ;;  %v687_v0 = vsel %vm238_vm0, %v685_v14, 0.0 }
 0x818   :  { %v688_v16 = vadd.f32 %v687_v0, %v686_v15 }
 0x81a   :  { %689 = vadd.xlane.f32.xlu1 %v688_v16 }
 0x81e   :  { %v854_v1 = vpop.eup %853 }
 0x81f   :  { %v658_v19 = vmul.f32 %v854_v1, %v1318_v51  ;;  %v659_v18 = vmul.f32 %v854_v1, %v1321_v52 }
 0x821   :  { %v662_v20 = vmul.f32 %v661_v17, %v658_v19  ;;  %v663_v63 = vmul.f32 %v661_v17, %v659_v18 }
 0x823   :  { %v666_v21 = vadd.f32 %v665_v55, %v662_v20  ;;  %v667_v22 = vadd.f32 %v665_v55, %v663_v63 }
 0x825   :  { %v724_v7 = vadd.f32 %v859_v23, %v666_v21  ;;  %v725_v8 = vadd.f32 %v860_v24, %v667_v22 }
 0x827   :  { %v726_v6 = vmax.f32 %v724_v7, 0.0  ;;  %v727_v35 = vmax.f32 %v725_v8, 0.0 }
 0x829   :  { %v728_v51 = vmin.f32 %v726_v6, 6.0  ;;  %v729_v10 = vmin.f32 %v727_v35, 6.0 }
 0x82b   :  { %738 = vst [vmem:[%s1382_s9 + $0x4] sm:$0x3] %v728_v51  ;;  %742 = vst [vmem:[%s1382_s9 + $0xc] sm:$0x3] %v729_v10 }
 0x8a7   :  { %v690_v52 = vpop.xlane.xlu1 %689 }
 0x8a8   :  { %v691_v13 = vrot.slane %v690_v52, 4 }
 0x8aa   :  { %v692_v25 = vadd.f32 %v691_v13, %v690_v52 }
 0x8ac   :  { %v693_v26 = vrot.slane %v692_v25, 2 }
 0x8ae   :  { %v694_v49 = vadd.f32 %v693_v26, %v692_v25 }
 0x8b0   :  { %v695_v27 = vrot.slane %v694_v49, 1 }
 0x8b2   :  { %v696_v50 = vadd.f32 %v695_v27, %v694_v49 }
 0x8b4   :  { %831 = vpush %v696_v50 }
 0x8e5   :  { %s832_s3 = spop %831 }
 0x8e6   :  { %v698_v2 = vstv %s832_s3 }
 0x8e7   :  { %v699_v58 = vmul.f32 0.001953125, %v698_v2 }
 0x8e9   :  { %v700_v3 = vadd.f32 1e-05, %v699_v58 }
 0x8eb   :  { %855 = vrsqrt.f32 %v700_v3 }
 0x8f5   :  { %v856_v59 = vpop.eup %855 }
 0x8f6   :  { %v702_v31 = vmul.f32 %v856_v59, %v682_v61  ;;  %v703_v32 = vmul.f32 %v856_v59, %v683_v36 }
 0x8f8   :  { %v706_v33 = vmul.f32 %v705_v4, %v702_v31  ;;  %v707_v12 = vmul.f32 %v705_v4, %v703_v32 }
 0x8fa   :  { %v710_v28 = vadd.f32 %v709_v11, %v706_v33  ;;  %v711_v29 = vadd.f32 %v709_v11, %v707_v12 }
 0x8fc   :  { %v730_v30 = vadd.f32 %v861_v34, %v710_v28  ;;  %v731_v37 = vadd.f32 %v862_v5, %v711_v29 }
 0x8fe   :  { %v732_v38 = vmax.f32 %v730_v30, 0.0  ;;  %v733_v39 = vmax.f32 %v731_v37, 0.0 }
 0x900   :  { %v734_v40 = vmin.f32 %v732_v38, 6.0  ;;  %v735_v42 = vmin.f32 %v733_v39, 6.0 }
 0x902   :  { %739 = vst [vmem:[%s1382_s9 + $0x6] sm:$0x3] %v734_v40  ;;  %743 = vst [vmem:[%s1382_s9 + $0xe] sm:$0x3] %v735_v42 }
 0x903   :  { %748 = vsyncpa [#allocation3], 1 }
 0x904   :  { %749 = vsyncpa [#allocation5], 1 }
 0x905   :  { %750 = vsyncpa [#allocation8], 1 }
 0x906   :  { %751 = vsyncpa [#allocation11], 1 }
 0x907   :  { %752 = vsyncpa [#allocation14], 1 }

</bundles_post_ra>
